<compile_context>
chip_gen: v7x
topology: tpu7x:2x2x1
jax: 0.10.0
libtpu: 0.0.40
codegen_flags: <defaults>
</compile_context>

<pallas_src>
import functools

import jax
import jax.numpy as jnp
from jax.experimental import pallas as pl
from jax.experimental.pallas import tpu as pltpu


# ======================= fused Pallas kernel =======================

def _linear_attention_kernel(x_ref, wqkv_ref, wo_ref, bo_ref, mask_ref, o_ref,
                             *, hidden):
    """One batch element per program, all tensors (channels, spatial) layout.

    x_ref   : (1, C, N)        NCHW input with flattened spatial on lanes
    wqkv_ref: (3*hidden, C)    native torch Conv2d weight (out_ch, in_ch)
    wo_ref  : (C, hidden)      native torch Conv2d weight (out_ch, in_ch)
    bo_ref  : (C, 1)
    mask_ref: (hidden, hidden) block-diagonal per-head mask (f32 0/1)
    o_ref   : (1, C, N)
    """
    x = x_ref[0]                                                  # (C, N) f32

    # to_qkv: 1x1 conv == one (3*hidden, C) @ (C, N) matmul. bf16 in, f32 acc.
    qkv = jnp.dot(wqkv_ref[...].astype(jnp.bfloat16),
                  x.astype(jnp.bfloat16),
                  preferred_element_type=jnp.float32)             # (3h, N) f32
    q = qkv[0 * hidden:1 * hidden, :]                             # (h, N)
    k = qkv[1 * hidden:2 * hidden, :]
    v = qkv[2 * hidden:3 * hidden, :]

    # k.softmax over spatial positions (lane axis), per (head, channel) row.
    # Kept in f32 (v5e has no bf16 VPU/EUP); divide -> EUP reciprocal.
    k_max = jnp.max(k, axis=1, keepdims=True)                     # (h, 1)
    k_exp = jnp.exp(k - k_max)                                    # (h, N)
    denom = jnp.sum(k_exp, axis=1, keepdims=True)                 # (h, 1)
    k_sm = k_exp * pl.reciprocal(denom, approx=True)              # (h, N)

    # Full context ctx[d, e] = sum_n k_sm[d, n] * v[e, n], then keep only the
    # per-head diagonal blocks (exact zeros off-block -> matches per-head einsum).
    ctx = jax.lax.dot_general(
        k_sm.astype(jnp.bfloat16), v.astype(jnp.bfloat16),
        (((1,), (1,)), ((), ())),
        preferred_element_type=jnp.float32)                       # (h, h) f32
    ctx = ctx * mask_ref[...]

    # Re-associated epilogue:
    #   out[e, n] = sum_d ctx[d, e] * q[d, n]
    #   y[c, n]   = sum_e Wo[c, e] * out[e, n] + b[c]
    #             = sum_d (sum_e Wo[c, e] * ctx[d, e]) * q[d, n] + b[c]
    wo_ctx = jax.lax.dot_general(
        wo_ref[...].astype(jnp.bfloat16), ctx.astype(jnp.bfloat16),
        (((1,), (1,)), ((), ())),
        preferred_element_type=jnp.float32)                       # (C, h) f32
    y = jnp.dot(wo_ctx.astype(jnp.bfloat16), q.astype(jnp.bfloat16),
                preferred_element_type=jnp.float32) + bo_ref[...] # (C, N) f32
    o_ref[0] = y


# ======================= wrapper =======================

def linear_attention(x_nchw, w_qkv, w_out, b_out, *, heads, dim_head):
    """x_nchw: (B, C, H, W);  w_qkv: (3*heads*dim_head, C) [torch Conv2d layout];
    w_out: (C, heads*dim_head) [torch Conv2d layout];  b_out: (C,).
    Returns (B, C, H, W)."""
    B, C, H, W = x_nchw.shape
    hidden = heads * dim_head
    N = H * W

    # Layout-free reshape only: NCHW -> (B, C, N). No transpose, no extra HBM pass.
    x = x_nchw.reshape(B, C, N).astype(jnp.float32)

    # Block-diagonal per-head mask, built once outside the kernel.
    head_id = jnp.arange(hidden, dtype=jnp.int32) // dim_head
    mask = (head_id[:, None] == head_id[None, :]).astype(jnp.float32)

    # Advisory cost so XLA can schedule around the custom call.
    flops = 2 * B * (3 * hidden * C * N       # qkv projection
                     + hidden * hidden * N    # context
                     + C * hidden * hidden    # Wo @ ctx^T
                     + C * hidden * N)        # (Wo ctx^T) @ q
    bytes_accessed = 4 * (2 * B * C * N + 3 * hidden * C + C * hidden + C
                          + hidden * hidden)
    cost = pl.CostEstimate(flops=flops,
                           transcendentals=B * hidden * N,
                           bytes_accessed=bytes_accessed)

    out = pl.pallas_call(
        functools.partial(_linear_attention_kernel, hidden=hidden),
        out_shape=jax.ShapeDtypeStruct((B, C, N), jnp.float32),
        grid=(B,),
        in_specs=[
            pl.BlockSpec((1, C, N), lambda b: (b, 0, 0)),
            pl.BlockSpec((3 * hidden, C), lambda b: (0, 0)),
            pl.BlockSpec((C, hidden), lambda b: (0, 0)),
            pl.BlockSpec((C, 1), lambda b: (0, 0)),
            pl.BlockSpec((hidden, hidden), lambda b: (0, 0)),
        ],
        out_specs=pl.BlockSpec((1, C, N), lambda b: (b, 0, 0)),
        compiler_params=pltpu.CompilerParams(
            dimension_semantics=("parallel",),
            vmem_limit_bytes=64 * 1024 * 1024),
        cost_estimate=cost,
    )(x, w_qkv, w_out, b_out.reshape(C, 1), mask)

    return out.reshape(B, C, H, W)


# ======================= pure-JAX reference (mirrors the torch code) =======================

def linear_attention_ref(x, w_qkv, w_out, b_out, heads, dim_head):
    B, C, H, W = x.shape
    hidden = heads * dim_head
    N = H * W
    hi = jax.lax.Precision.HIGHEST
    xf = x.reshape(B, C, N)
    qkv = jnp.einsum('kc,bcn->bkn', w_qkv, xf, precision=hi)       # (B, 3*hidden, N)
    qkv = qkv.reshape(B, 3, heads, dim_head, N)
    q, k, v = qkv[:, 0], qkv[:, 1], qkv[:, 2]                      # (B, h, d, N)
    k = jax.nn.softmax(k, axis=-1)
    context = jnp.einsum('bhdn,bhen->bhde', k, v, precision=hi)
    out = jnp.einsum('bhde,bhdn->bhen', context, q, precision=hi)
    out = out.reshape(B, hidden, N)
    y = jnp.einsum('ck,bkn->bcn', w_out, out, precision=hi) + b_out[None, :, None]
    return y.reshape(B, C, H, W)


# ======================= demo / self-check =======================

if __name__ == "__main__":
    key = jax.random.PRNGKey(0)
    kx, kq, ko, kb = jax.random.split(key, 4)

    B, DIM, H, W = 2, 64, 16, 16
    HEADS, DIM_HEAD = 4, 32               # module defaults -> hidden = 128
    HIDDEN = HEADS * DIM_HEAD

    x = jax.random.normal(kx, (B, DIM, H, W), jnp.float32)
    # Native PyTorch Conv2d weight layouts (out_channels, in_channels):
    w_qkv = 0.05 * jax.random.normal(kq, (3 * HIDDEN, DIM), jnp.float32)
    w_out = 0.05 * jax.random.normal(ko, (DIM, HIDDEN), jnp.float32)
    b_out = 0.01 * jax.random.normal(kb, (DIM,), jnp.float32)

    fwd = jax.jit(functools.partial(linear_attention, heads=HEADS, dim_head=DIM_HEAD))
    out = jax.block_until_ready(fwd(x, w_qkv, w_out, b_out))

    assert out.shape == (B, DIM, H, W), out.shape
    assert bool(jnp.all(jnp.isfinite(out)))

    ref = linear_attention_ref(x, w_qkv, w_out, b_out, HEADS, DIM_HEAD)
    rel_err = float(jnp.max(jnp.abs(out - ref)) / (jnp.max(jnp.abs(ref)) + 1e-6))
    # bf16 MXU operands (f32 accumulation) + approx reciprocal -> slightly looser
    # than a pure-f32 match, still far from any structural error.
    assert rel_err < 2e-2, f"mismatch vs reference: rel-max-err={rel_err}"

    print("KERNEL_OK")
</pallas_src>

<mosaic_0001>
module attributes {stable_mosaic.version = 11 : i64} {
  func.func @_linear_attention_kernel(%arg0: i32, %arg1: memref<1x64x256xf32, #tpu.memory_space<vmem>>, %arg2: memref<384x64xf32, #tpu.memory_space<vmem>>, %arg3: memref<64x128xf32, #tpu.memory_space<vmem>>, %arg4: memref<64x1xf32, #tpu.memory_space<vmem>>, %arg5: memref<128x128xf32, #tpu.memory_space<vmem>>, %arg6: memref<1x64x256xf32, #tpu.memory_space<vmem>>) attributes {dimension_semantics = [#tpu.dimension_semantics<parallel>], iteration_bounds = array<i64: 2>, scalar_prefetch = 0 : i64, scratch_operands = 0 : i64, tpu.core_type = #tpu.core_type<tc>, window_params = [{transform_indices = @transform_0, window_bounds = array<i64: 1, 64, 256>}, {pipeline_mode = #tpu.pipeline_mode<synchronous>, transform_indices = @transform_1, window_bounds = array<i64: 384, 64>}, {pipeline_mode = #tpu.pipeline_mode<synchronous>, transform_indices = @transform_2, window_bounds = array<i64: 64, 128>}, {pipeline_mode = #tpu.pipeline_mode<synchronous>, transform_indices = @transform_3, window_bounds = array<i64: 64, 1>}, {pipeline_mode = #tpu.pipeline_mode<synchronous>, transform_indices = @transform_4, window_bounds = array<i64: 128, 128>}, {transform_indices = @transform_5, window_bounds = array<i64: 1, 64, 256>}]} {
    %c0 = arith.constant 0 : index
    %c0_0 = arith.constant 0 : index
    %c0_1 = arith.constant 0 : index
    %0 = vector.load %arg1[%c0, %c0_0, %c0_1] : memref<1x64x256xf32, #tpu.memory_space<vmem>>, vector<1x64x256xf32>
    %1 = vector.shape_cast %0 : vector<1x64x256xf32> to vector<64x256xf32>
    %c0_2 = arith.constant 0 : index
    %c0_3 = arith.constant 0 : index
    %2 = vector.load %arg2[%c0_2, %c0_3] : memref<384x64xf32, #tpu.memory_space<vmem>>, vector<384x64xf32>
    %3 = arith.truncf %2 : vector<384x64xf32> to vector<384x64xbf16>
    %4 = arith.truncf %1 : vector<64x256xf32> to vector<64x256xbf16>
    %cst = arith.constant dense<0.000000e+00> : vector<384x256xf32>
    %5 = tpu.matmul %3, %4, %cst {dimension_numbers = #tpu.dot_dimension_numbers<[1], [0], [0], [1], [0, 0, 1, 1], [], []>} : vector<384x64xbf16>, vector<64x256xbf16>, vector<384x256xf32> -> vector<384x256xf32>
    %6 = vector.extract_strided_slice %5 {offsets = [0, 0], sizes = [128, 256], strides = [1, 1]} : vector<384x256xf32> to vector<128x256xf32>
    %7 = vector.extract_strided_slice %5 {offsets = [128, 0], sizes = [128, 256], strides = [1, 1]} : vector<384x256xf32> to vector<128x256xf32>
    %8 = vector.extract_strided_slice %5 {offsets = [256, 0], sizes = [128, 256], strides = [1, 1]} : vector<384x256xf32> to vector<128x256xf32>
    %cst_4 = arith.constant dense<0xFF800000> : vector<128xf32>
    %9 = vector.multi_reduction <maximumf>, %7, %cst_4 [1] : vector<128x256xf32> to vector<128xf32>
    %10 = vector.shape_cast %9 : vector<128xf32> to vector<128x1xf32>
    %11 = vector.broadcast %10 : vector<128x1xf32> to vector<128x256xf32>
    %12 = arith.subf %7, %11 : vector<128x256xf32>
    %13 = math.exp %12 : vector<128x256xf32>
    %cst_5 = arith.constant dense<0.000000e+00> : vector<128xf32>
    %14 = vector.multi_reduction <add>, %13, %cst_5 [1] : vector<128x256xf32> to vector<128xf32>
    %15 = vector.shape_cast %14 : vector<128xf32> to vector<128x1xf32>
    %16 = tpu.reciprocal %15 {approx = true} : vector<128x1xf32> -> vector<128x1xf32>
    %17 = vector.broadcast %16 : vector<128x1xf32> to vector<128x256xf32>
    %18 = arith.mulf %13, %17 : vector<128x256xf32>
    %19 = arith.truncf %18 : vector<128x256xf32> to vector<128x256xbf16>
    %20 = arith.truncf %8 : vector<128x256xf32> to vector<128x256xbf16>
    %cst_6 = arith.constant dense<0.000000e+00> : vector<128x128xf32>
    %21 = tpu.matmul %19, %20, %cst_6 {dimension_numbers = #tpu.dot_dimension_numbers<[1], [1], [0], [0], [0, 0, 1, 0], [], []>} : vector<128x256xbf16>, vector<128x256xbf16>, vector<128x128xf32> -> vector<128x128xf32>
    %c0_7 = arith.constant 0 : index
    %c0_8 = arith.constant 0 : index
    %22 = vector.load %arg5[%c0_7, %c0_8] : memref<128x128xf32, #tpu.memory_space<vmem>>, vector<128x128xf32>
    %23 = arith.mulf %21, %22 : vector<128x128xf32>
    %c0_9 = arith.constant 0 : index
    %c0_10 = arith.constant 0 : index
    %24 = vector.load %arg3[%c0_9, %c0_10] : memref<64x128xf32, #tpu.memory_space<vmem>>, vector<64x128xf32>
    %25 = arith.truncf %24 : vector<64x128xf32> to vector<64x128xbf16>
    %26 = arith.truncf %23 : vector<128x128xf32> to vector<128x128xbf16>
    %cst_11 = arith.constant dense<0.000000e+00> : vector<64x128xf32>
    %27 = tpu.matmul %25, %26, %cst_11 {dimension_numbers = #tpu.dot_dimension_numbers<[1], [1], [0], [0], [0, 0, 1, 0], [], []>} : vector<64x128xbf16>, vector<128x128xbf16>, vector<64x128xf32> -> vector<64x128xf32>
    %28 = arith.truncf %27 : vector<64x128xf32> to vector<64x128xbf16>
    %29 = arith.truncf %6 : vector<128x256xf32> to vector<128x256xbf16>
    %cst_12 = arith.constant dense<0.000000e+00> : vector<64x256xf32>
    %30 = tpu.matmul %28, %29, %cst_12 {dimension_numbers = #tpu.dot_dimension_numbers<[1], [0], [0], [1], [0, 0, 1, 1], [], []>} : vector<64x128xbf16>, vector<128x256xbf16>, vector<64x256xf32> -> vector<64x256xf32>
    %c0_13 = arith.constant 0 : index
    %c0_14 = arith.constant 0 : index
    %31 = vector.load %arg4[%c0_13, %c0_14] : memref<64x1xf32, #tpu.memory_space<vmem>>, vector<64x1xf32>
    %32 = vector.broadcast %31 : vector<64x1xf32> to vector<64x256xf32>
    %33 = arith.addf %30, %32 : vector<64x256xf32>
    %c0_15 = arith.constant 0 : index
    %c0_16 = arith.constant 0 : index
    %c0_17 = arith.constant 0 : index
    %34 = vector.load %arg6[%c0_15, %c0_16, %c0_17] : memref<1x64x256xf32, #tpu.memory_space<vmem>>, vector<1x64x256xf32>
    %35 = vector.shape_cast %34 : vector<1x64x256xf32> to vector<64x256xf32>
    %36 = vector.shape_cast %33 : vector<64x256xf32> to vector<1x64x256xf32>
    tpu.vector_store %arg6[%c0_15, %c0_16, %c0_17], %36 {strides = array<i32>} : memref<1x64x256xf32, #tpu.memory_space<vmem>>, vector<1x64x256xf32>,
    return
  }
  func.func @transform_0(%arg0: i32) -> (i32, i32, i32) {
    %c0_i32 = arith.constant 0 : i32
    %c0_i32_0 = arith.constant 0 : i32
    %c0_i32_1 = arith.constant 0 : i32
    return %arg0, %c0_i32, %c0_i32_0 : i32, i32, i32
  }
  func.func @transform_1(%arg0: i32) -> (i32, i32) {
    %c0_i32 = arith.constant 0 : i32
    %c0_i32_0 = arith.constant 0 : i32
    %c0_i32_1 = arith.constant 0 : i32
    return %c0_i32, %c0_i32_0 : i32, i32
  }
  func.func @transform_2(%arg0: i32) -> (i32, i32) {
    %c0_i32 = arith.constant 0 : i32
    %c0_i32_0 = arith.constant 0 : i32
    %c0_i32_1 = arith.constant 0 : i32
    return %c0_i32, %c0_i32_0 : i32, i32
  }
  func.func @transform_3(%arg0: i32) -> (i32, i32) {
    %c0_i32 = arith.constant 0 : i32
    %c0_i32_0 = arith.constant 0 : i32
    %c0_i32_1 = arith.constant 0 : i32
    return %c0_i32, %c0_i32_0 : i32, i32
  }
  func.func @transform_4(%arg0: i32) -> (i32, i32) {
    %c0_i32 = arith.constant 0 : i32
    %c0_i32_0 = arith.constant 0 : i32
    %c0_i32_1 = arith.constant 0 : i32
    return %c0_i32, %c0_i32_0 : i32, i32
  }
  func.func @transform_5(%arg0: i32) -> (i32, i32, i32) {
    %c0_i32 = arith.constant 0 : i32
    %c0_i32_0 = arith.constant 0 : i32
    %c0_i32_1 = arith.constant 0 : i32
    return %arg0, %c0_i32, %c0_i32_0 : i32, i32, i32
  }
}

</mosaic_0001>

<bundles_post_ra>
// kernel: linear_attention.1
= control target key start
LH: loop header
LB: loop body
LE: loop exit
PB: predicated region body
PF: predicated region fallthrough
CT: control target
= control target key end

     0   :  { %10 = vsyncpa [#allocation3], 0  ;;  %s2833_s0 = inlined_call_operand.hbm [shape: f32[2,64,256], index: 0, kind: input, shape index: {}]   ;;  %s2834_s1 = inlined_call_operand.hbm [shape: f32[384,64], index: 1, kind: input, shape index: {}]   ;;  %s2835_s2 = inlined_call_operand.hbm [shape: f32[64,128], index: 2, kind: input, shape index: {}]   ;;  %s2836_s3 = inlined_call_operand.hbm [shape: f32[64,1], index: 3, kind: input, shape index: {}]   ;;  %s2837_s4 = inlined_call_operand.hbm [shape: f32[128,128], index: 4, kind: input, shape index: {}]   ;;  %s2838_s5 = inlined_call_operand.hbm [shape: f32[2,64,256], index: 5, kind: output, shape index: {}]  }
   0x1   :  { %12 = vsyncpa [#allocation3 + $0x1], 0 }
   0x2   :  { %13 = vsyncpa [#allocation6], 0 }
   0x3   :  { %14 = vsyncpa [#allocation9], 0 }
   0x4   :  { %15 = vsyncpa [#allocation4], 0 }
   0x5   :  { %17 = vsyncpa [#allocation4 + $0x1], 0  ;;  %s2049_s18 = smov 0   ;;  %s2051_s19 = smov 0  }
   0x6   :  { %s2053_s20 = smov 0   ;;  %s2055_s21 = smov 0  }
   0x7 LB: > { %s2070_s22 = sadd.s32 4294967295, %s2004_s21   ;;  %s1512_s23 = sadd.s32 4294967294, %s2004_s21   ;;  %s2004_s21 = sphi %s2055_s21, %s2937_s21   ;;  %s2000_s20 = sphi %s2053_s20, %s2936_s20   ;;  %s1996_s19 = sphi %s2051_s19, %s2935_s19   ;;  %s1992_s18 = sphi %s2049_s18, %s2934_s18  }
   0x8   : > { %p43_p0 = scmp.ne.s32.totalorder %s1996_s19, %s1992_s18  ;;  %p2839_p1 = scmp.eq.s32.totalorder %s2070_s22, 0 }
   0x9   : > { %p157_p3 = scmp.eq.s32.totalorder %s1512_s23, 1  ;;  %p1513_p5 = scmp.ge.s32.totalorder %s2004_s21, 1 }
   0xa   : > { %p2079_p4 = por %p2839_p1, %p43_p0  ;;  %p164_p7 = scmp.lt.s32.totalorder %s2004_s21, 3 }
   0xb   : > { %p2084_p6 = por %p157_p3, %p43_p0  ;;  %s2006_s27 = smov [#allocation5]  }
   0xc   : > { %s2863_s24 = scalar_select %p2079_p4, 1, 0 }
   0xd   : > { %s2864_s25 = scalar_select %p2084_p6, 1, 0 }
   0xe   : > { %p2089_p8 = pnand %p1513_p5, %p164_p7  ;;  %s176_s28 = sshll.u32 %s2006_s27, 4  ;;  %s2093_s28 = int_to_ptr.vmem [resolvable:$true] %s176_s28 }
   0xf   : > { %s2007_s30 = smov [#allocation8]   ;;  %s2008_s7 = smov [#allocation7]  }
  0x10   : > { %s2865_s26 = scalar_select %p2089_p8, 1, 0 }
  0x11   : > { %p1616_p9 = pneg %p2089_p8  ;;  %s202_s6 = sshll.u32 %s2007_s30, 4  ;;  %s2104_s6 = int_to_ptr.vmem [resolvable:$true] %s202_s6 }
  0x12   : > { %s2106_s8 = sshll.u32 %s2008_s7, 4  ;;  %s1788_s11 = scalar_lea.hbm %s2834_s1, 6144  ;;  %s190_s8 = int_to_ptr.vmem [resolvable:$true] %s2106_s8 }
  0x13   : > { %p2100_p11 = pnand %p1616_p9, %p2839_p1  ;;  %p1789_p12 = scmp.ne.s32.totalorder %s2834_s1, %s1788_s11 }
  0x14   : > { %p1795_p5 = scmp.lt.u32.totalorder %s1788_s11, %s2834_s1 }
  0x15   : > { %p2116_p13 = pneg %p2100_p11 }
  0x17   : > { %p1791_p0 = pnand %p2116_p13, %p1789_p12 }
  0x19   : > { %p1792_p3 = pneg %p1791_p0 }
  0x1b   : > { %p1797_p7 = pnand %p1795_p5, %p1792_p3 }
  0x1d   : > { %1800 = shalt.err (!%p1797_p7)
}
  0x1e   : > { %s1801_s17 = scalar_lea.vmem %s2093_s28, 6144  ;;  %p1809_p2 = scmp.lt.s32.totalorder %s2093_s28, %s2093_s28 }
  0x1f   : > { %p1802_p9 = scmp.ne.s32.totalorder %s2093_s28, %s1801_s17  ;;  %p1810_p6 = scmp.lt.s32.totalorder %s1801_s17, %s1801_s17 }
  0x21   : > { %p1804_p10 = pnand %p1802_p9, %p2116_p13  ;;  %p1811_p12 = por %p1810_p6, %p1809_p2 }
  0x23   : > { %p1805_p1 = pneg %p1804_p10 }
  0x25   : > { %p1812_p0 = pnand %p1811_p12, %p1805_p1 }
  0x27   : > { %1815 = shalt.err (!%p1812_p0)
}
  0x28   : > { %s2009_s23 = smov 128   ;;  %s2010_s27 = smov 8  }
  0x29   : > { %1619 = dma.hbm_to_vmem [thread:$0]  (!%p2100_p11), %s2834_s1, 6144, %s2093_s28, [#allocation6], %s2009_s23, %s2009_s23, %s2010_s27  }
  0x2a   : > { %s1816_s11 = scalar_lea.hbm %s2836_s3, 1024 }
  0x2b   : > { %p1817_p1 = scmp.ne.s32.totalorder %s2836_s3, %s1816_s11  ;;  %p1823_p10 = scmp.lt.u32.totalorder %s1816_s11, %s2836_s3 }
  0x2d   : > { %p1819_p2 = pnand %p1817_p1, %p2116_p13 }
  0x2f   : > { %p1820_p6 = pneg %p1819_p2 }
  0x31   : > { %p1825_p3 = pnand %p1823_p10, %p1820_p6 }
  0x33   : > { %1828 = shalt.err (!%p1825_p3)
}
  0x34   : > { %s1829_s28 = scalar_lea.vmem %s2104_s6, 1024  ;;  %p1837_p12 = scmp.lt.s32.totalorder %s2104_s6, %s2104_s6 }
  0x35   : > { %p1830_p5 = scmp.ne.s32.totalorder %s2104_s6, %s1829_s28  ;;  %p1838_p0 = scmp.lt.s32.totalorder %s1829_s28, %s1829_s28 }
  0x37   : > { %p1832_p7 = pnand %p1830_p5, %p2116_p13  ;;  %p1839_p1 = por %p1838_p0, %p1837_p12 }
  0x39   : > { %p1833_p9 = pneg %p1832_p7 }
  0x3b   : > { %p1840_p2 = pnand %p1839_p1, %p1833_p9 }
  0x3d   : > { %1843 = shalt.err (!%p1840_p2)
}
  0x3e   : > { %1625 = dma.hbm_to_vmem [thread:$0]  (!%p2100_p11), %s2836_s3, 1024, %s2104_s6, [#allocation9], %s2009_s23, %s2009_s23, %s2010_s27  }
  0x3f   : > { %s1844_s10 = scalar_lea.hbm %s2835_s2, 1024 }
  0x40   : > { %p1845_p6 = scmp.ne.s32.totalorder %s2835_s2, %s1844_s10  ;;  %p1851_p5 = scmp.lt.u32.totalorder %s1844_s10, %s2835_s2 }
  0x42   : > { %p1847_p10 = pnand %p1845_p6, %p2116_p13 }
  0x44   : > { %p1848_p3 = pneg %p1847_p10 }
  0x46   : > { %p1853_p7 = pnand %p1851_p5, %p1848_p3 }
  0x48   : > { %1856 = shalt.err (!%p1853_p7)
}
  0x49   : > { %s1857_s16 = scalar_lea.vmem %s190_s8, 1024  ;;  %p1865_p1 = scmp.lt.s32.totalorder %s190_s8, %s190_s8 }
  0x4a   : > { %p1858_p9 = scmp.ne.s32.totalorder %s190_s8, %s1857_s16  ;;  %p1866_p2 = scmp.lt.s32.totalorder %s1857_s16, %s1857_s16 }
  0x4c   : > { %p1860_p12 = pnand %p1858_p9, %p2116_p13  ;;  %p1867_p4 = por %p1866_p2, %p1865_p1 }
  0x4e   : > { %p1861_p0 = pneg %p1860_p12 }
  0x50   : > { %p1868_p8 = pnand %p1867_p4, %p1861_p0 }
  0x52   : > { %1871 = shalt.err (!%p1868_p8)
}
  0x53   : > { %1622 = dma.hbm_to_vmem [thread:$0]  (!%p2100_p11), %s2835_s2, 1024, %s190_s8, [#allocation6], %s2009_s23, %s2009_s23, %s2010_s27  }
  0x54   : > { %s2011_s17 = smov [#allocation10]   ;;  %s1872_s10 = scalar_lea.hbm %s2837_s4, 2048 }
  0x55   : > { %s215_s30 = sshll.u32 %s2011_s17, 4  ;;  %p1873_p4 = scmp.ne.s32.totalorder %s2837_s4, %s1872_s10  ;;  %s216_s30 = int_to_ptr.vmem [resolvable:$true] %s215_s30 }
  0x56   : > { %p1879_p10 = scmp.lt.u32.totalorder %s1872_s10, %s2837_s4 }
  0x57   : > { %p1875_p8 = pnand %p1873_p4, %p2116_p13 }
  0x59   : > { %p1876_p6 = pneg %p1875_p8 }
  0x5b   : > { %p1881_p3 = pnand %p1879_p10, %p1876_p6 }
  0x5d   : > { %1884 = shalt.err (!%p1881_p3)
}
  0x5e   : > { %s1885_s8 = scalar_lea.vmem %s216_s30, 2048  ;;  %p1893_p12 = scmp.lt.s32.totalorder %s216_s30, %s216_s30 }
  0x5f   : > { %p1886_p5 = scmp.ne.s32.totalorder %s216_s30, %s1885_s8  ;;  %p1894_p0 = scmp.lt.s32.totalorder %s1885_s8, %s1885_s8 }
  0x61   : > { %p1888_p7 = pnand %p1886_p5, %p2116_p13  ;;  %p1895_p1 = por %p1894_p0, %p1893_p12 }
  0x63   : > { %p1889_p9 = pneg %p1888_p7 }
  0x65   : > { %p1896_p2 = pnand %p1895_p1, %p1889_p9 }
  0x67   : > { %1899 = shalt.err (!%p1896_p2)
}
  0x68   : > { %1628 = dma.hbm_to_vmem [thread:$0]  (!%p2100_p11), %s2837_s4, 2048, %s216_s30, [#allocation9], %s2009_s23, %s2009_s23, %s2010_s27  }
  0x69   : > { %s2210_s14 = sadd.s32 1, %s2004_s21   ;;  %s30_s29 = sadd.s32 1, %s2000_s20 }
  0x6a   : > { %s27_s28 = ssub.s32 %s2004_s21, %s2210_s14  ;;  %p37_p13 = scmp.ne.s32.totalorder %s2000_s20, %s1996_s19 }
  0x6b   : > { %p28_p4 = scmp.eq.s32.totalorder %s27_s28, 0  ;;  %p38_p8 = scmp.eq.s32.totalorder %s2004_s21, 0 }
  0x6c   : > { %p2868_p6 = scmp.eq.s32.totalorder %s2070_s22, 1  ;;  %p1641_p3 = scmp.lt.s32.totalorder %s2004_s21, 2 }
  0x6d   : > { %s2226_s7 = scalar_select %p28_p4, %s2000_s20, %s30_s29  }
  0x6e   : > { %p2220_p10 = por %p2868_p6, %p37_p13  ;;  %p39_p5 = por %p38_p8, %p37_p13 }
  0x6f   : > { %s229_s9 = sand.u32 1, %s2000_s20   ;;  %s1558_s23 = sshll.u32 %s2004_s21, 11 }
  0x70   : > { %s1519_s10 = sshll.u32 %s229_s9, 7  ;;  %s2233_s11 = scalar_lea.hbm %s2833_s0, %s1558_s23 }
  0x71   : > { %s233_s12 = scalar_lea.vmem [#allocation2], %s1519_s10  ;;  %p2237_p11 = pnand %p1641_p3, %p39_p5 }
  0x72   : > { %s240_s13 = sshll.u32 %s233_s12, 4  ;;  %s2241_s8 = scalar_lea.sflag [#allocation3], %s229_s9  ;;  %s2235_s13 = int_to_ptr.vmem [resolvable:$true] %s240_s13 }
  0x73   : > { %s1900_s16 = scalar_lea.hbm %s2233_s11, 2048  ;;  %p1902_p9 = pneg %p2237_p11 }
  0x74   : > { %p1901_p7 = scmp.ne.s32.totalorder %s2233_s11, %s1900_s16  ;;  %s1905_s28 = scalar_lea.hbm %s2833_s0, 4096 }
  0x75   : > { %p1906_p1 = scmp.lt.u32.totalorder %s2233_s11, %s2833_s0  ;;  %p1907_p2 = scmp.lt.u32.totalorder %s1905_s28, %s1900_s16 }
  0x76   : > { %p1903_p12 = pnand %p1902_p9, %p1901_p7  ;;  %p1909_p4 = scmp.lt.u32.totalorder %s1900_s16, %s2233_s11 }
  0x77   : > { %p1908_p13 = por %p1907_p2, %p1906_p1 }
  0x78   : > { %p1904_p0 = pneg %p1903_p12 }
  0x79   : > { %p1910_p8 = por %p1909_p4, %p1908_p13 }
  0x7b   : > { %p1911_p6 = pnand %p1910_p8, %p1904_p0 }
  0x7d   : > { %1914 = shalt.err (!%p1911_p6)
}
  0x7e   : > { %s1915_s9 = scalar_lea.vmem %s2235_s13, 2048  ;;  %s2012_s27 = smov [#allocation2]  }
  0x7f   : > { %p1916_p3 = scmp.ne.s32.totalorder %s2235_s13, %s1915_s9  ;;  %s1920_s30 = sshll.u32 %s2012_s27, 4  ;;  %s1921_s30 = int_to_ptr.vmem [resolvable:$false] %s1920_s30 }
  0x80   : > { %s1922_s12 = scalar_lea.vmem %s1921_s30, 4096  ;;  %p1923_p12 = scmp.lt.s32.totalorder %s2235_s13, %s1921_s30 }
  0x81   : > { %p1918_p5 = pnand %p1916_p3, %p1902_p9  ;;  %p1924_p1 = scmp.lt.s32.totalorder %s1922_s12, %s1915_s9 }
  0x83   : > { %p1919_p7 = pneg %p1918_p5  ;;  %p1925_p2 = por %p1924_p1, %p1923_p12 }
  0x85   : > { %p1926_p13 = pnand %p1925_p2, %p1919_p7 }
  0x87   : > { %1929 = shalt.err (!%p1926_p13)
}
  0x88   : > { %s2013_s16 = smov 256   ;;  %s2014_s6 = smov 16  }
  0x89   : > { %1632 = dma.hbm_to_vmem [thread:$0]  (!%p2237_p11), %s2233_s11, 2048, %s2235_s13, %s2241_s8, %s2013_s16, %s2013_s16, %s2014_s6  }
  0x8a   : > { %p2871_p9 = scmp.ne.s32.totalorder %s2865_s26, 0 }
  0x8c   : > { %252 = sbr.rel (%p2871_p9) target bundleno = 1533 (0x5fd), region = 40 }
  0x93   : > { %s2272_s29 = sand.u32 1, %s1996_s19   ;;  %p2872_p0 = scmp.ne.s32.totalorder %s2863_s24, 0 }
  0x94   : > { %s1523_s28 = sshll.u32 %s2272_s29, 7  ;;  %s255_s10 = scalar_lea.sflag [#allocation3], %s2272_s29 }
  0x95   : > { %s2278_s23 = scalar_lea.vmem [#allocation2], %s1523_s28 }
  0x96   : > { %1975 = dma.done.wait (%p2872_p0), %s255_s10, 2048  }
  0x97   : > { %1977 = vsyncadd (%p2872_p0), %s255_s10, 4294965248  ;;  %p2873_p11 = scmp.eq.s32.totalorder %s2070_s22, 0 }
  0x99   : > { %1979 = dma.done.wait (%p2873_p11), [#allocation6], 7168   ;;  %p2874_p4 = pmov %p2873_p11 }
  0x9b   : > { %1981 = vsyncadd (%p2874_p4), [#allocation6], 4294960128  ;;  %p2875_p8 = pmov %p2874_p4 }
  0x9c   : > { %p2876_p6 = pmov %p2874_p4 }
  0x9d   : > { %1983 = dma.done.wait (%p2875_p8), [#allocation9], 3072  }
  0x9e   : > { %1985 = vsyncadd (%p2876_p6), [#allocation9], 4294964224  ;;  %v2842_v0 = vmov 0   ;;  %v303_v1 = vld [vmem:[%s2278_s23 + $0x8] sm:$0xff]  ;;  %v305_v2 = vld [vmem:[%s2278_s23 + $0x18] sm:$0xff]  ;;  %vm398_vm0 = vcmask 523264  }
  0x9f   : > { %503 = vmatprep.mubr.bf16.mxu0 %v2842_v0  ;;  %1691 = vset.pattern.permute.xlu1 %v2842_v0  ;;  %v302_v3 = vld [vmem:[%s2278_s23] sm:$0xff]  ;;  %v391_v4 = vpack.c.bf16 %v305_v2, %v303_v1  ;;  %v304_v5 = vld [vmem:[%s2278_s23 + $0x10] sm:$0xff]  ;;  %v307_v6 = vld [vmem:[%s2278_s23 + $0x28] sm:$0xff]  ;;  %s2764_s24 = scalar_lea.vmem [#allocation11], %s1523_s28  ;;  %s1559_s26 = sshll.u32 %s2070_s22, 11 }
  0xa0   : > { %1690 = vset.pattern.permute.xlu0 %v2842_v0  ;;  %v309_v7 = vld [vmem:[%s2278_s23 + $0x38] sm:$0xff]  ;;  %v390_v8 = vpack.c.bf16 %v304_v5, %v302_v3  ;;  %v306_v10 = vld [vmem:[%s2278_s23 + $0x20] sm:$0xff]  ;;  %v308_v11 = vld [vmem:[%s2278_s23 + $0x30] sm:$0xff]  ;;  %s1401_s11 = sshll.u32 %s2764_s24, 4  ;;  %s2784_s8 = scalar_lea.hbm %s2838_s5, %s1559_s26  ;;  %s2786_s11 = int_to_ptr.vmem [resolvable:$true] %s1401_s11 }
  0xa1   : > { %v393_v9 = vpack.c.bf16 %v309_v7, %v307_v6  ;;  %v311_v12 = vld [vmem:[%s2278_s23 + $0x48] sm:$0xff]  ;;  %471 = vmatprep.subr.bf16.mxu0 %v391_v4  ;;  %v313_v13 = vld [vmem:[%s2278_s23 + $0x58] sm:$0xff]  ;;  %v392_v14 = vpack.c.bf16 %v308_v11, %v306_v10  ;;  %v310_v16 = vld [vmem:[%s2278_s23 + $0x40] sm:$0xff]  ;;  %s1388_s22 = scalar_lea.sflag [#allocation4], %s2272_s29  ;;  %s1930_s9 = scalar_lea.vmem %s2786_s11, 2048 }
  0xa2   : > { %472 = vmatpush1.bf16.msra.mxu0 %v390_v8  ;;  %v395_v15 = vpack.c.bf16 %v313_v13, %v311_v12  ;;  %v312_v17 = vld [vmem:[%s2278_s23 + $0x50] sm:$0xff]  ;;  %v315_v18 = vld [vmem:[%s2278_s23 + $0x68] sm:$0xff]  ;;  %v317_v19 = vld [vmem:[%s2278_s23 + $0x78] sm:$0xff]  ;;  %p1931_p3 = scmp.ne.s32.totalorder %s2786_s11, %s1930_s9  ;;  %s2016_s27 = smov [#allocation11]  }
  0xa3   : > { %473 = vmatprep.subr.bf16.mxu0 %v393_v9  ;;  %v394_v20 = vpack.c.bf16 %v312_v17, %v310_v16  ;;  %v397_v21 = vpack.c.bf16 %v317_v19, %v315_v18  ;;  %v314_v22 = vld [vmem:[%s2278_s23 + $0x60] sm:$0xff]  ;;  %v316_v23 = vld [vmem:[%s2278_s23 + $0x70] sm:$0xff]  ;;  %v319_v26 = vld [vmem:[#allocation5 + $0x8] sm:$0xff]  ;;  %s1934_s30 = sshll.u32 %s2016_s27, 4  ;;  %s1935_s30 = int_to_ptr.vmem [resolvable:$false] %s1934_s30 }
  0xa4   : > { %v396_v24 = vpack.c.bf16 %v316_v23, %v314_v22  ;;  %v318_v25 = vld [vmem:[#allocation5] sm:$0xff]  ;;  %v320_v28 = vld [vmem:[#allocation5 + $0x10] sm:$0xff]  ;;  %v321_v29 = vld [vmem:[#allocation5 + $0x18] sm:$0xff]  ;;  %p1932_p5 = pnand %p1931_p3, %p2220_p10  ;;  %s1936_s12 = scalar_lea.vmem %s1935_s30, 4096 }
  0xa5   : > { %v366_v27 = vpack.c.bf16 %v319_v26, %v318_v25  ;;  %v367_v30 = vpack.c.bf16 %v321_v29, %v320_v28  ;;  %v322_v31 = vld [vmem:[#allocation5 + $0x20] sm:$0xff]  ;;  %v323_v32 = vld [vmem:[#allocation5 + $0x28] sm:$0xff]  ;;  %v324_v34 = vld [vmem:[#allocation5 + $0x30] sm:$0xff]  ;;  %p1937_p12 = scmp.lt.s32.totalorder %s2786_s11, %s1935_s30  ;;  %p1938_p1 = scmp.lt.s32.totalorder %s1936_s12, %s1930_s9 }
  0xa6   : > { %474 = vmatpush1.bf16.msra.mxu0 %v392_v14  ;;  %v368_v33 = vpack.c.bf16 %v323_v32, %v322_v31  ;;  %v325_v35 = vld [vmem:[#allocation5 + $0x38] sm:$0xff]  ;;  %v326_v37 = vld [vmem:[#allocation5 + $0x40] sm:$0xff]  ;;  %v327_v38 = vld [vmem:[#allocation5 + $0x48] sm:$0xff]  ;;  %p1933_p7 = pneg %p1932_p5 }
  0xa7   : > { %475 = vmatprep.subr.bf16.mxu0 %v395_v15  ;;  %v369_v36 = vpack.c.bf16 %v325_v35, %v324_v34  ;;  %v370_v39 = vpack.c.bf16 %v327_v38, %v326_v37  ;;  %v328_v40 = vld [vmem:[#allocation5 + $0x50] sm:$0xff]  ;;  %v329_v41 = vld [vmem:[#allocation5 + $0x58] sm:$0xff]  ;;  %v330_v43 = vld [vmem:[#allocation5 + $0x60] sm:$0xff]  ;;  %p1939_p2 = por %p1938_p1, %p1937_p12 }
  0xa8   : > { %v371_v42 = vpack.c.bf16 %v329_v41, %v328_v40  ;;  %v331_v44 = vld [vmem:[#allocation5 + $0x68] sm:$0xff]  ;;  %v332_v46 = vld [vmem:[#allocation5 + $0x70] sm:$0xff]  ;;  %v333_v47 = vld [vmem:[#allocation5 + $0x78] sm:$0xff] }
  0xa9   : > { %v372_v45 = vpack.c.bf16 %v331_v44, %v330_v43  ;;  %v373_v48 = vpack.c.bf16 %v333_v47, %v332_v46  ;;  %v334_v49 = vld [vmem:[#allocation5 + $0x80] sm:$0xff]  ;;  %v335_v50 = vld [vmem:[#allocation5 + $0x88] sm:$0xff]  ;;  %v336_v52 = vld [vmem:[#allocation5 + $0x90] sm:$0xff]  ;;  %p1940_p13 = pnand %p1939_p2, %p1933_p7 }
  0xaa   : > { %476 = vmatpush1.bf16.msra.mxu0 %v394_v20  ;;  %v374_v51 = vpack.c.bf16 %v335_v50, %v334_v49  ;;  %v337_v53 = vld [vmem:[#allocation5 + $0x98] sm:$0xff]  ;;  %v338_v55 = vld [vmem:[#allocation5 + $0xa0] sm:$0xff]  ;;  %v339_v56 = vld [vmem:[#allocation5 + $0xa8] sm:$0xff] }
  0xab   : > { %477 = vmatprep.subr.bf16.mxu0 %v397_v21  ;;  %v375_v54 = vpack.c.bf16 %v337_v53, %v336_v52  ;;  %v376_v57 = vpack.c.bf16 %v339_v56, %v338_v55  ;;  %v340_v58 = vld [vmem:[#allocation5 + $0xb0] sm:$0xff]  ;;  %v341_v59 = vld [vmem:[#allocation5 + $0xb8] sm:$0xff]  ;;  %v342_v61 = vld [vmem:[#allocation5 + $0xc0] sm:$0xff] }
  0xac   : > { %v377_v60 = vpack.c.bf16 %v341_v59, %v340_v58  ;;  %v343_v62 = vld [vmem:[#allocation5 + $0xc8] sm:$0xff]  ;;  %v344_v1 = vld [vmem:[#allocation5 + $0xd0] sm:$0xff]  ;;  %v345_v2 = vld [vmem:[#allocation5 + $0xd8] sm:$0xff] }
  0xad   : > { %v378_v63 = vpack.c.bf16 %v343_v62, %v342_v61  ;;  %v379_v3 = vpack.c.bf16 %v345_v2, %v344_v1  ;;  %v346_v4 = vld [vmem:[#allocation5 + $0xe0] sm:$0xff]  ;;  %v347_v5 = vld [vmem:[#allocation5 + $0xe8] sm:$0xff]  ;;  %v348_v7 = vld [vmem:[#allocation5 + $0xf0] sm:$0xff] }
  0xae   : > { %478 = vmatpush1.bf16.msra.mxu0 %v396_v24  ;;  %v380_v6 = vpack.c.bf16 %v347_v5, %v346_v4  ;;  %v349_v8 = vld [vmem:[#allocation5 + $0xf8] sm:$0xff]  ;;  %v350_v10 = vld [vmem:[#allocation5 + $0x100] sm:$0xff]  ;;  %v351_v11 = vld [vmem:[#allocation5 + $0x108] sm:$0xff] }
  0xaf   : > { %v381_v9 = vpack.c.bf16 %v349_v8, %v348_v7  ;;  %v382_v12 = vpack.c.bf16 %v351_v11, %v350_v10  ;;  %v352_v13 = vld [vmem:[#allocation5 + $0x110] sm:$0xff]  ;;  %v353_v14 = vld [vmem:[#allocation5 + $0x118] sm:$0xff]  ;;  %v354_v16 = vld [vmem:[#allocation5 + $0x120] sm:$0xff] }
  0xb0   : > { %v383_v15 = vpack.c.bf16 %v353_v14, %v352_v13  ;;  %v355_v17 = vld [vmem:[#allocation5 + $0x128] sm:$0xff]  ;;  %v356_v19 = vld [vmem:[#allocation5 + $0x130] sm:$0xff]  ;;  %v357_v20 = vld [vmem:[#allocation5 + $0x138] sm:$0xff] }
  0xb1   : > { %1529 = vmatmul.mubr.msk.bf16.vlgmr.msra.gmra.mrb[0].mxu0 %vm398_vm0, %v366_v27  ;;  %v384_v18 = vpack.c.bf16 %v355_v17, %v354_v16  ;;  %v385_v21 = vpack.c.bf16 %v357_v20, %v356_v19  ;;  %v358_v24 = vld [vmem:[#allocation5 + $0x140] sm:$0xff]  ;;  %v359_v25 = vld [vmem:[#allocation5 + $0x148] sm:$0xff]  ;;  %v361_v34 = vld [vmem:[#allocation5 + $0x158] sm:$0xff] }
  0xb2   : > { %513 = vmatprep.mubr.bf16.mxu0 %v2842_v0  ;;  %v363_v43 = vld [vmem:[#allocation5 + $0x168] sm:$0xff]  ;;  %v365_v52 = vld [vmem:[#allocation5 + $0x178] sm:$0xff] }
  0xb9   : > { %1530 = vmatmul.mubr.msk.bf16.gmra.mrb[4].mxu0 %vm398_vm0, %v367_v30  ;;  %v386_v30 = vpack.c.bf16 %v359_v25, %v358_v24 }
  0xba   : > { %523 = vmatprep.mubr.bf16.mxu0 %v2842_v0 }
  0xc1   : > { %1531 = vmatmul.mubr.msk.bf16.gmra.mrb[8].mxu0 %vm398_vm0, %v368_v33  ;;  %v360_v33 = vld [vmem:[#allocation5 + $0x150] sm:$0xff] }
  0xc2   : > { %533 = vmatprep.mubr.bf16.mxu0 %v2842_v0 }
  0xc9   : > { %1532 = vmatmul.mubr.msk.bf16.gmra.mrb[12].mxu0 %vm398_vm0, %v369_v36 }
  0xca   : > { %543 = vmatprep.mubr.bf16.mxu0 %v2842_v0 }
  0xd1   : > { %1533 = vmatmul.mubr.msk.bf16.gmra.mrb[16].mxu0 %vm398_vm0, %v370_v39  ;;  %v387_v39 = vpack.c.bf16 %v361_v34, %v360_v33 }
  0xd2   : > { %553 = vmatprep.mubr.bf16.mxu0 %v2842_v0 }
  0xd9   : > { %1534 = vmatmul.mubr.msk.bf16.gmra.mrb[20].mxu0 %vm398_vm0, %v371_v42  ;;  %v362_v42 = vld [vmem:[#allocation5 + $0x160] sm:$0xff] }
  0xda   : > { %563 = vmatprep.mubr.bf16.mxu0 %v2842_v0 }
  0xe1   : > { %1535 = vmatmul.mubr.msk.bf16.gmra.mrb[24].mxu0 %vm398_vm0, %v372_v45 }
  0xe2   : > { %573 = vmatprep.mubr.bf16.mxu0 %v2842_v0 }
  0xe9   : > { %1536 = vmatmul.mubr.msk.bf16.gmra.mrb[28].mxu0 %vm398_vm0, %v373_v48  ;;  %v388_v48 = vpack.c.bf16 %v363_v43, %v362_v42 }
  0xea   : > { %583 = vmatprep.mubr.bf16.mxu0 %v2842_v0 }
  0xf1   : > { %1537 = vmatmul.mubr.msk.bf16.gmra.mrb[32].mxu0 %vm398_vm0, %v374_v51  ;;  %v364_v51 = vld [vmem:[#allocation5 + $0x170] sm:$0xff] }
  0xf2   : > { %593 = vmatprep.mubr.bf16.mxu0 %v2842_v0 }
  0xf9   : > { %1538 = vmatmul.mubr.msk.bf16.gmra.mrb[36].mxu0 %vm398_vm0, %v375_v54 }
  0xfa   : > { %603 = vmatprep.mubr.bf16.mxu0 %v2842_v0 }
 0x101   : > { %1539 = vmatmul.mubr.msk.bf16.gmra.mrb[40].mxu0 %vm398_vm0, %v376_v57  ;;  %v389_v57 = vpack.c.bf16 %v365_v52, %v364_v51 }
 0x102   : > { %613 = vmatprep.mubr.bf16.mxu0 %v2842_v0 }
 0x109   : > { %1540 = vmatmul.mubr.msk.bf16.gmra.mrb[44].mxu0 %vm398_vm0, %v377_v60 }
 0x10a   : > { %623 = vmatprep.mubr.bf16.mxu0 %v2842_v0 }
 0x111   : > { %1541 = vmatmul.mubr.msk.bf16.gmra.mrb[48].mxu0 %vm398_vm0, %v378_v63 }
 0x112   : > { %633 = vmatprep.mubr.bf16.mxu0 %v2842_v0 }
 0x119   : > { %1542 = vmatmul.mubr.msk.bf16.gmra.mrb[52].mxu0 %vm398_vm0, %v379_v3 }
 0x11a   : > { %643 = vmatprep.mubr.bf16.mxu0 %v2842_v0 }
 0x121   : > { %1543 = vmatmul.mubr.msk.bf16.gmra.mrb[56].mxu0 %vm398_vm0, %v380_v6 }
 0x122   : > { %653 = vmatprep.mubr.bf16.mxu0 %v2842_v0 }
 0x129   : > { %1544 = vmatmul.mubr.msk.bf16.gmra.mrb[60].mxu0 %vm398_vm0, %v381_v9 }
 0x12a   : > { %663 = vmatprep.mubr.bf16.mxu0 %v2842_v0 }
 0x131   : > { %1545 = vmatmul.mubr.msk.bf16.gmra.mrb[64].mxu0 %vm398_vm0, %v382_v12 }
 0x132   : > { %673 = vmatprep.mubr.bf16.mxu0 %v2842_v0 }
 0x139   : > { %1546 = vmatmul.mubr.msk.bf16.gmra.mrb[68].mxu0 %vm398_vm0, %v383_v15 }
 0x13a   : > { %683 = vmatprep.mubr.bf16.mxu0 %v2842_v0 }
 0x141   : > { %1547 = vmatmul.mubr.msk.bf16.gmra.mrb[72].mxu0 %vm398_vm0, %v384_v18 }
 0x142   : > { %693 = vmatprep.mubr.bf16.mxu0 %v2842_v0 }
 0x149   : > { %1548 = vmatmul.mubr.msk.bf16.gmra.mrb[76].mxu0 %vm398_vm0, %v385_v21 }
 0x14a   : > { %703 = vmatprep.mubr.bf16.mxu0 %v2842_v0 }
 0x151   : > { %1549 = vmatmul.mubr.msk.bf16.gmra.mrb[80].mxu0 %vm398_vm0, %v386_v30 }
 0x152   : > { %713 = vmatprep.mubr.bf16.mxu0 %v2842_v0 }
 0x159   : > { %1550 = vmatmul.mubr.msk.bf16.gmra.mrb[84].mxu0 %vm398_vm0, %v387_v39 }
 0x15a   : > { %723 = vmatprep.mubr.bf16.mxu0 %v2842_v0 }
 0x161   : > { %1551 = vmatmul.mubr.msk.bf16.gmra.mrb[88].mxu0 %vm398_vm0, %v388_v48 }
 0x162   : > { %733 = vmatprep.mubr.bf16.mxu0 %v2842_v0 }
 0x169   : > { %1552 = vmatmul.mubr.msk.bf16.gmra.mrb[92].mxu0 %vm398_vm0, %v389_v57 }
 0x184   : > { %v2349_v22 = vpop.f32.mrb[0].mxu0 }
 0x185   : > { %v2352_v23 = vpop.f32.mrb[1].mxu0 }
 0x186   : > { %v2355_v26 = vpop.f32.mrb[2].mxu0 }
 0x187   : > { %v2359_v28 = vpop.f32.mrb[3].mxu0 }
 0x18c   : > { %v2363_v31 = vpop.f32.mrb[4].mxu0 }
 0x18d   : > { %v2366_v32 = vpop.f32.mrb[5].mxu0 }
 0x18e   : > { %v2369_v35 = vpop.f32.mrb[6].mxu0 }
 0x18f   : > { %v2373_v37 = vpop.f32.mrb[7].mxu0 }
 0x194   : > { %v2377_v40 = vpop.f32.mrb[8].mxu0 }
 0x195   : > { %v2380_v41 = vpop.f32.mrb[9].mxu0 }
 0x196   : > { %v2383_v44 = vpop.f32.mrb[10].mxu0 }
 0x197   : > { %v2387_v46 = vpop.f32.mrb[11].mxu0 }
 0x19c   : > { %v2391_v49 = vpop.f32.mrb[12].mxu0 }
 0x19d   : > { %2877 = vst [vmem:[#allocation16_spill] sm:$0xff] %v2391_v49  ;;  %v2394_v50 = vpop.f32.mrb[13].mxu0 }
 0x19e   : > { %2878 = vst [vmem:[#allocation17_spill] sm:$0xff] %v2394_v50  ;;  %v2397_v53 = vpop.f32.mrb[14].mxu0 }
 0x19f   : > { %2879 = vst [vmem:[#allocation18_spill] sm:$0xff] %v2397_v53  ;;  %v2401_v55 = vpop.f32.mrb[15].mxu0 }
 0x1a4   : > { %v2405_v58 = vpop.f32.mrb[16].mxu0 }
 0x1a5   : > { %2880 = vst [vmem:[#allocation19_spill] sm:$0xff] %v2405_v58  ;;  %v2408_v59 = vpop.f32.mrb[17].mxu0 }
 0x1a6   : > { %2881 = vst [vmem:[#allocation20_spill] sm:$0xff] %v2408_v59  ;;  %v2410_v60 = vpop.f32.mrb[18].mxu0 }
 0x1a7   : > { %2882 = vst [vmem:[#allocation21_spill] sm:$0xff] %v2410_v60  ;;  %v2414_v62 = vpop.f32.mrb[19].mxu0 }
 0x1a8   : > { %2883 = vst [vmem:[#allocation22_spill] sm:$0xff] %v2414_v62 }
 0x1ac   : > { %v2418_v1 = vpop.f32.mrb[20].mxu0 }
 0x1ad   : > { %2884 = vst [vmem:[#allocation23_spill] sm:$0xff] %v2418_v1  ;;  %v2420_v2 = vpop.f32.mrb[21].mxu0 }
 0x1ae   : > { %2885 = vst [vmem:[#allocation24_spill] sm:$0xff] %v2420_v2  ;;  %v2422_v3 = vpop.f32.mrb[22].mxu0 }
 0x1af   : > { %2886 = vst [vmem:[#allocation25_spill] sm:$0xff] %v2422_v3  ;;  %v2426_v5 = vpop.f32.mrb[23].mxu0 }
 0x1b0   : > { %2887 = vst [vmem:[#allocation26_spill] sm:$0xff] %v2426_v5 }
 0x1b4   : > { %v2430_v7 = vpop.f32.mrb[24].mxu0 }
 0x1b5   : > { %2888 = vst [vmem:[#allocation27_spill] sm:$0xff] %v2430_v7  ;;  %v2432_v8 = vpop.f32.mrb[25].mxu0 }
 0x1b6   : > { %2889 = vst [vmem:[#allocation28_spill] sm:$0xff] %v2432_v8  ;;  %v2434_v9 = vpop.f32.mrb[26].mxu0 }
 0x1b7   : > { %2890 = vst [vmem:[#allocation29_spill] sm:$0xff] %v2434_v9  ;;  %v2438_v11 = vpop.f32.mrb[27].mxu0 }
 0x1b8   : > { %2891 = vst [vmem:[#allocation30_spill] sm:$0xff] %v2438_v11 }
 0x1bc   : > { %v2442_v13 = vpop.f32.mrb[28].mxu0 }
 0x1bd   : > { %2892 = vst [vmem:[#allocation31_spill] sm:$0xff] %v2442_v13  ;;  %v2444_v14 = vpop.f32.mrb[29].mxu0 }
 0x1be   : > { %2893 = vst [vmem:[#allocation32_spill] sm:$0xff] %v2444_v14  ;;  %v2446_v15 = vpop.f32.mrb[30].mxu0 }
 0x1bf   : > { %2894 = vst [vmem:[#allocation33_spill] sm:$0xff] %v2446_v15  ;;  %v2450_v17 = vpop.f32.mrb[31].mxu0 }
 0x1c0   : > { %2895 = vst [vmem:[#allocation34_spill] sm:$0xff] %v2450_v17 }
 0x1c4   : > { %v2454_v19 = vpop.f32.mrb[32].mxu0 }
 0x1c5   : > { %v2456_v20 = vpop.f32.mrb[33].mxu0 }
 0x1c6   : > { %v2458_v21 = vpop.f32.mrb[34].mxu0  ;;  %v744_v24 = vmax.f32 %v2454_v19, %v2456_v20 }
 0x1c7   : > { %v2462_v25 = vpop.f32.mrb[35].mxu0 }
 0x1c8   : > { %745 = vmax.xlane.f32.xlu0 %v744_v24  ;;  %v747_v30 = vmax.f32 %v2458_v21, %v2462_v25 }
 0x1cc   : > { %748 = vmax.xlane.f32.xlu0 %v747_v30  ;;  %v2466_v33 = vpop.f32.mrb[36].mxu0 }
 0x1cd   : > { %v2468_v34 = vpop.f32.mrb[37].mxu0 }
 0x1ce   : > { %v2470_v39 = vpop.f32.mrb[38].mxu0  ;;  %v750_v42 = vmax.f32 %v2466_v33, %v2468_v34 }
 0x1cf   : > { %v2474_v43 = vpop.f32.mrb[39].mxu0 }
 0x1d0   : > { %751 = vmax.xlane.f32.xlu1 %v750_v42  ;;  %v753_v48 = vmax.f32 %v2470_v39, %v2474_v43 }
 0x1d4   : > { %754 = vmax.xlane.f32.xlu1 %v753_v48  ;;  %v2478_v51 = vpop.f32.mrb[40].mxu0 }
 0x1d5   : > { %v2480_v52 = vpop.f32.mrb[41].mxu0 }
 0x1d6   : > { %v2482_v57 = vpop.f32.mrb[42].mxu0  ;;  %v756_v24 = vmax.f32 %v2478_v51, %v2480_v52 }
 0x1d7   : > { %v2486_v30 = vpop.f32.mrb[43].mxu0 }
 0x1d8   : > { %757 = vmax.xlane.f32.xlu0 %v756_v24  ;;  %v759_v16 = vmax.f32 %v2482_v57, %v2486_v30 }
 0x1da   : > { %760 = vmax.xlane.f32.xlu1 %v759_v16 }
 0x1dc   : > { %v2490_v42 = vpop.f32.mrb[44].mxu0 }
 0x1dd   : > { %v2492_v18 = vpop.f32.mrb[45].mxu0 }
 0x1de   : > { %v2494_v48 = vpop.f32.mrb[46].mxu0  ;;  %v762_v10 = vmax.f32 %v2490_v42, %v2492_v18 }
 0x1df   : > { %v2498_v12 = vpop.f32.mrb[47].mxu0 }
 0x1e0   : > { %763 = vmax.xlane.f32.xlu0 %v762_v10  ;;  %v765_v4 = vmax.f32 %v2494_v48, %v2498_v12 }
 0x1e2   : > { %766 = vmax.xlane.f32.xlu1 %v765_v4 }
 0x1e4   : > { %v2502_v24 = vpop.f32.mrb[48].mxu0 }
 0x1e5   : > { %v2504_v6 = vpop.f32.mrb[49].mxu0 }
 0x1e6   : > { %v2506_v16 = vpop.f32.mrb[50].mxu0  ;;  %v768_v61 = vmax.f32 %v2502_v24, %v2504_v6 }
 0x1e7   : > { %v2510_v63 = vpop.f32.mrb[51].mxu0 }
 0x1e8   : > { %769 = vmax.xlane.f32.xlu0 %v768_v61  ;;  %v771_v54 = vmax.f32 %v2506_v16, %v2510_v63 }
 0x1ea   : > { %772 = vmax.xlane.f32.xlu1 %v771_v54 }
 0x1ec   : > { %v2514_v10 = vpop.f32.mrb[52].mxu0 }
 0x1ed   : > { %v2516_v56 = vpop.f32.mrb[53].mxu0 }
 0x1ee   : > { %v2518_v4 = vpop.f32.mrb[54].mxu0  ;;  %v774_v0 = vmax.f32 %v2514_v10, %v2516_v56 }
 0x1ef   : > { %v2522_v45 = vpop.f32.mrb[55].mxu0 }
 0x1f0   : > { %775 = vmax.xlane.f32.xlu0 %v774_v0  ;;  %v777_v47 = vmax.f32 %v2518_v4, %v2522_v45 }
 0x1f2   : > { %778 = vmax.xlane.f32.xlu1 %v777_v47 }
 0x1f4   : > { %v2526_v61 = vpop.f32.mrb[56].mxu0 }
 0x1f5   : > { %v2528_v36 = vpop.f32.mrb[57].mxu0 }
 0x1f6   : > { %v2530_v54 = vpop.f32.mrb[58].mxu0  ;;  %v780_v38 = vmax.f32 %v2526_v61, %v2528_v36 }
 0x1f7   : > { %v2534_v27 = vpop.f32.mrb[59].mxu0 }
 0x1f8   : > { %781 = vmax.xlane.f32.xlu0 %v780_v38  ;;  %v783_v29 = vmax.f32 %v2530_v54, %v2534_v27 }
 0x1fa   : > { %784 = vmax.xlane.f32.xlu1 %v783_v29 }
 0x1fc   : > { %v2538_v0 = vpop.f32.mrb[60].mxu0 }
 0x1fd   : > { %v2540_v13 = vpop.f32.mrb[61].mxu0 }
 0x1fe   : > { %v2542_v47 = vpop.f32.mrb[62].mxu0  ;;  %v786_v15 = vmax.f32 %v2538_v0, %v2540_v13 }
 0x1ff   : > { %v2546_v14 = vpop.f32.mrb[63].mxu0 }
 0x200   : > { %787 = vmax.xlane.f32.xlu0 %v786_v15  ;;  %v789_v17 = vmax.f32 %v2542_v47, %v2546_v14 }
 0x202   : > { %790 = vmax.xlane.f32.xlu1 %v789_v17 }
 0x204   : > { %v665_v38 = vpop.f32.mrb[64].mxu0 }
 0x205   : > { %v667_v7 = vpop.f32.mrb[65].mxu0 }
 0x206   : > { %v669_v9 = vpop.f32.mrb[66].mxu0 }
 0x207   : > { %v1000_v29 = vpack.c.bf16 %v669_v9, %v665_v38  ;;  %v671_v8 = vpop.f32.mrb[67].mxu0 }
 0x208   : > { %v1001_v11 = vpack.c.bf16 %v671_v8, %v667_v7 }
 0x20a   : > { %1016 = vmatprep.subr.bf16.mxu1 %v1001_v11 }
 0x20b   : > { %1017 = vmatpush1.bf16.xpose.msra.mxu1 %v1000_v29 }
 0x20c   : > { %v675_v1 = vpop.f32.mrb[68].mxu0 }
 0x20d   : > { %v677_v3 = vpop.f32.mrb[69].mxu0 }
 0x20e   : > { %v679_v2 = vpop.f32.mrb[70].mxu0 }
 0x20f   : > { %v1002_v5 = vpack.c.bf16 %v679_v2, %v675_v1  ;;  %v681_v58 = vpop.f32.mrb[71].mxu0 }
 0x210   : > { %v1003_v60 = vpack.c.bf16 %v681_v58, %v677_v3 }
 0x212   : > { %1018 = vmatprep.subr.bf16.mxu1 %v1003_v60 }
 0x213   : > { %1019 = vmatpush1.bf16.xpose.msra.mxu1 %v1002_v5 }
 0x214   : > { %v685_v15 = vpop.f32.mrb[72].mxu0 }
 0x215   : > { %v687_v59 = vpop.f32.mrb[73].mxu0 }
 0x216   : > { %v689_v62 = vpop.f32.mrb[74].mxu0 }
 0x217   : > { %v1004_v17 = vpack.c.bf16 %v689_v62, %v685_v15  ;;  %v691_v49 = vpop.f32.mrb[75].mxu0 }
 0x218   : > { %v1005_v53 = vpack.c.bf16 %v691_v49, %v687_v59 }
 0x21a   : > { %1020 = vmatprep.subr.bf16.mxu1 %v1005_v53 }
 0x21b   : > { %1021 = vmatpush1.bf16.xpose.msra.mxu1 %v1004_v17 }
 0x21c   : > { %v695_v9 = vpop.f32.mrb[76].mxu0 }
 0x21d   : > { %v697_v2 = vpop.f32.mrb[77].mxu0 }
 0x21e   : > { %v699_v60 = vpop.f32.mrb[78].mxu0 }
 0x21f   : > { %v1006_v5 = vpack.c.bf16 %v699_v60, %v695_v9  ;;  %v701_v49 = vpop.f32.mrb[79].mxu0 }
 0x220   : > { %v1007_v53 = vpack.c.bf16 %v701_v49, %v697_v2 }
 0x222   : > { %1022 = vmatprep.subr.bf16.mxu1 %v1007_v53 }
 0x223   : > { %1023 = vmatpush1.bf16.xpose.msra.mxu1 %v1006_v5 }
 0x224   : > { %v705_v29 = vpop.f32.mrb[80].mxu0 }
 0x225   : > { %v707_v17 = vpop.f32.mrb[81].mxu0 }
 0x255   : > { %v746_v50 = vpop.xlane.xlu0 %745 }
 0x256   : > { %v792_v7 = vsub.f32 %v2454_v19, %v746_v50  ;;  %v793_v8 = vsub.f32 %v2456_v20, %v746_v50 }
 0x258   : > { %v824_v11 = vmul.f32 1.442695, %v792_v7  ;;  %v826_v1 = vmul.f32 1.442695, %v793_v8  ;;  %v709_v7 = vpop.f32.mrb[82].mxu0 }
 0x259   : > { %v749_v58 = vpop.xlane.xlu0 %748 }
 0x25a   : > { %1692 = vpow2.f32 %v824_v11  ;;  %v794_v3 = vsub.f32 %v2458_v21, %v749_v58  ;;  %v795_v62 = vsub.f32 %v2462_v25, %v749_v58  ;;  %v1008_v11 = vpack.c.bf16 %v709_v7, %v705_v29 }
 0x25b   : > { %1694 = vpow2.f32 %v826_v1  ;;  %v711_v1 = vpop.f32.mrb[83].mxu0 }
 0x25c   : > { %v828_v59 = vmul.f32 1.442695, %v794_v3  ;;  %v830_v19 = vmul.f32 1.442695, %v795_v62  ;;  %v1009_v2 = vpack.c.bf16 %v711_v1, %v707_v17  ;;  %v715_v49 = vpop.f32.mrb[84].mxu0 }
 0x25d   : > { %v752_v38 = vpop.xlane.xlu1 %751 }
 0x25e   : > { %1696 = vpow2.f32 %v828_v59  ;;  %v796_v50 = vsub.f32 %v2466_v33, %v752_v38  ;;  %v797_v20 = vsub.f32 %v2468_v34, %v752_v38  ;;  %1024 = vmatprep.subr.bf16.mxu1 %v1009_v2 }
 0x25f   : > { %1698 = vpow2.f32 %v830_v19  ;;  %1025 = vmatpush1.bf16.xpose.msra.mxu1 %v1008_v11 }
 0x260   : > { %v832_v15 = vmul.f32 1.442695, %v796_v50  ;;  %v834_v21 = vmul.f32 1.442695, %v797_v20  ;;  %v717_v20 = vpop.f32.mrb[85].mxu0 }
 0x261   : > { %v755_v25 = vpop.xlane.xlu1 %754 }
 0x262   : > { %1700 = vpow2.f32 %v832_v15  ;;  %v798_v8 = vsub.f32 %v2470_v39, %v755_v25  ;;  %v799_v9 = vsub.f32 %v2474_v43, %v755_v25 }
 0x263   : > { %1702 = vpow2.f32 %v834_v21 }
 0x264   : > { %v2558_v33 = vpop.eup %1692  ;;  %v836_v34 = vmul.f32 1.442695, %v798_v8  ;;  %v838_v58 = vmul.f32 1.442695, %v799_v9 }
 0x265   : > { %v2560_v60 = vpop.eup %1694  ;;  %v758_v3 = vpop.xlane.xlu0 %757 }
 0x266   : > { %1704 = vpow2.f32 %v836_v34  ;;  %v800_v62 = vsub.f32 %v2478_v51, %v758_v3  ;;  %v801_v5 = vsub.f32 %v2480_v52, %v758_v3  ;;  %v888_v39 = vadd.f32 %v2560_v60, %v2558_v33  ;;  %v719_v52 = vpop.f32.mrb[86].mxu0 }
 0x267   : > { %1706 = vpow2.f32 %v838_v58  ;;  %v761_v43 = vpop.xlane.xlu1 %760  ;;  %v721_v17 = vpop.f32.mrb[87].mxu0  ;;  %v1010_v25 = vpack.c.bf16 %v719_v52, %v715_v49 }
 0x268   : > { %v2566_v53 = vpop.eup %1696  ;;  %v840_v59 = vmul.f32 1.442695, %v800_v62  ;;  %v842_v19 = vmul.f32 1.442695, %v801_v5  ;;  %v802_v38 = vsub.f32 %v2482_v57, %v761_v43  ;;  %v803_v50 = vsub.f32 %v2486_v30, %v761_v43  ;;  %889 = vadd.xlane.f32.xlu0 %v888_v39  ;;  %v725_v34 = vpop.f32.mrb[88].mxu0 }
 0x269   : > { %v2570_v51 = vpop.eup %1698  ;;  %v1011_v7 = vpack.c.bf16 %v721_v17, %v717_v20  ;;  %v727_v43 = vpop.f32.mrb[89].mxu0 }
 0x26a   : > { %1708 = vpow2.f32 %v840_v59  ;;  %v844_v29 = vmul.f32 1.442695, %v802_v38  ;;  %v846_v15 = vmul.f32 1.442695, %v803_v50  ;;  %v891_v21 = vadd.f32 %v2570_v51, %v2566_v53 }
 0x26b   : > { %1710 = vpow2.f32 %v842_v19  ;;  %1026 = vmatprep.subr.bf16.mxu1 %v1011_v7 }
 0x26c   : > { %v2574_v8 = vpop.eup %1700  ;;  %1712 = vpow2.f32 %v844_v29  ;;  %892 = vadd.xlane.f32.xlu1 %v891_v21  ;;  %1027 = vmatpush1.bf16.xpose.msra.mxu1 %v1010_v25 }
 0x26d   : > { %v2576_v57 = vpop.eup %1702  ;;  %1714 = vpow2.f32 %v846_v15  ;;  %v764_v30 = vpop.xlane.xlu0 %763 }
 0x26e   : > { %v804_v9 = vsub.f32 %v2490_v42, %v764_v30  ;;  %v805_v11 = vsub.f32 %v2492_v18, %v764_v30  ;;  %v894_v1 = vadd.f32 %v2576_v57, %v2574_v8  ;;  %v729_v42 = vpop.f32.mrb[90].mxu0 }
 0x26f   : > { %v767_v2 = vpop.xlane.xlu1 %766  ;;  %v731_v38 = vpop.f32.mrb[91].mxu0  ;;  %v1012_v50 = vpack.c.bf16 %v729_v42, %v725_v34 }
 0x270   : > { %v2582_v58 = vpop.eup %1704  ;;  %v848_v3 = vmul.f32 1.442695, %v804_v9  ;;  %v850_v62 = vmul.f32 1.442695, %v805_v11  ;;  %v806_v5 = vsub.f32 %v2494_v48, %v767_v2  ;;  %v807_v39 = vsub.f32 %v2498_v12, %v767_v2  ;;  %895 = vadd.xlane.f32.xlu0 %v894_v1  ;;  %v735_v30 = vpop.f32.mrb[92].mxu0 }
 0x271   : > { %v2586_v49 = vpop.eup %1706  ;;  %v1013_v20 = vpack.c.bf16 %v731_v38, %v727_v43 }
 0x272   : > { %1716 = vpow2.f32 %v848_v3  ;;  %v852_v18 = vmul.f32 1.442695, %v806_v5  ;;  %v854_v59 = vmul.f32 1.442695, %v807_v39  ;;  %v897_v19 = vadd.f32 %v2586_v49, %v2582_v58  ;;  %v737_v3 = vpop.f32.mrb[93].mxu0 }
 0x273   : > { %1718 = vpow2.f32 %v850_v62  ;;  %1028 = vmatprep.subr.bf16.mxu1 %v1013_v20  ;;  %v739_v62 = vpop.f32.mrb[94].mxu0 }
 0x274   : > { %v2590_v52 = vpop.eup %1708  ;;  %1720 = vpow2.f32 %v852_v18  ;;  %898 = vadd.xlane.f32.xlu1 %v897_v19  ;;  %1029 = vmatpush1.bf16.xpose.msra.mxu1 %v1012_v50  ;;  %v1014_v39 = vpack.c.bf16 %v739_v62, %v735_v30  ;;  %v741_v43 = vpop.f32.mrb[95].mxu0 }
 0x275   : > { %v2592_v12 = vpop.eup %1710  ;;  %1722 = vpow2.f32 %v854_v59  ;;  %v770_v48 = vpop.xlane.xlu0 %769 }
 0x276   : > { %v2594_v29 = vpop.eup %1712  ;;  %v808_v15 = vsub.f32 %v2502_v24, %v770_v48  ;;  %v809_v21 = vsub.f32 %v2504_v6, %v770_v48  ;;  %v900_v17 = vadd.f32 %v2592_v12, %v2590_v52 }
 0x277   : > { %v2600_v25 = vpop.eup %1714  ;;  %v773_v7 = vpop.xlane.xlu1 %772 }
 0x278   : > { %v856_v9 = vmul.f32 1.442695, %v808_v15  ;;  %v858_v11 = vmul.f32 1.442695, %v809_v21  ;;  %v810_v1 = vsub.f32 %v2506_v16, %v773_v7  ;;  %v811_v2 = vsub.f32 %v2510_v63, %v773_v7  ;;  %901 = vadd.xlane.f32.xlu0 %v900_v17 }
 0x279   : > { %v903_v24 = vadd.f32 %v2600_v25, %v2594_v29  ;;  %v1015_v16 = vpack.c.bf16 %v741_v43, %v737_v3 }
 0x27a   : > { %1724 = vpow2.f32 %v856_v9  ;;  %v860_v6 = vmul.f32 1.442695, %v810_v1  ;;  %v862_v34 = vmul.f32 1.442695, %v811_v2 }
 0x27b   : > { %1726 = vpow2.f32 %v858_v11  ;;  %904 = vadd.xlane.f32.xlu1 %v903_v24  ;;  %1030 = vmatprep.subr.bf16.mxu1 %v1015_v16 }
 0x27c   : > { %v2606_v5 = vpop.eup %1716  ;;  %1728 = vpow2.f32 %v860_v6  ;;  %1031 = vmatpush1.bf16.xpose.msra.mxu1 %v1014_v39 }
 0x27d   : > { %v2608_v42 = vpop.eup %1718  ;;  %1730 = vpow2.f32 %v862_v34  ;;  %v776_v63 = vpop.xlane.xlu0 %775 }
 0x27e   : > { %v2610_v18 = vpop.eup %1720  ;;  %v812_v59 = vsub.f32 %v2514_v10, %v776_v63  ;;  %v813_v19 = vsub.f32 %v2516_v56, %v776_v63  ;;  %v906_v38 = vadd.f32 %v2608_v42, %v2606_v5 }
 0x27f   : > { %v2616_v50 = vpop.eup %1722  ;;  %v779_v20 = vpop.xlane.xlu1 %778 }
 0x280   : > { %v864_v48 = vmul.f32 1.442695, %v812_v59  ;;  %v866_v15 = vmul.f32 1.442695, %v813_v19  ;;  %v814_v21 = vsub.f32 %v2518_v4, %v779_v20  ;;  %v815_v17 = vsub.f32 %v2522_v45, %v779_v20  ;;  %907 = vadd.xlane.f32.xlu0 %v906_v38 }
 0x281   : > { %v909_v10 = vadd.f32 %v2616_v50, %v2610_v18 }
 0x282   : > { %1732 = vpow2.f32 %v864_v48  ;;  %v868_v56 = vmul.f32 1.442695, %v814_v21  ;;  %v870_v7 = vmul.f32 1.442695, %v815_v17 }
 0x283   : > { %1734 = vpow2.f32 %v866_v15  ;;  %910 = vadd.xlane.f32.xlu1 %v909_v10 }
 0x284   : > { %v2622_v30 = vpop.eup %1724  ;;  %1736 = vpow2.f32 %v868_v56 }
 0x285   : > { %v2624_v9 = vpop.eup %1726  ;;  %1738 = vpow2.f32 %v870_v7  ;;  %v782_v11 = vpop.xlane.xlu0 %781 }
 0x286   : > { %v2626_v4 = vpop.eup %1728  ;;  %v816_v45 = vsub.f32 %v2526_v61, %v782_v11  ;;  %v817_v1 = vsub.f32 %v2528_v36, %v782_v11  ;;  %v912_v2 = vadd.f32 %v2624_v9, %v2622_v30 }
 0x287   : > { %v2632_v24 = vpop.eup %1730  ;;  %v785_v6 = vpop.xlane.xlu1 %784 }
 0x288   : > { %v872_v34 = vmul.f32 1.442695, %v816_v45  ;;  %v874_v3 = vmul.f32 1.442695, %v817_v1  ;;  %v818_v62 = vsub.f32 %v2530_v54, %v785_v6  ;;  %v819_v39 = vsub.f32 %v2534_v27, %v785_v6  ;;  %913 = vadd.xlane.f32.xlu0 %v912_v2 }
 0x289   : > { %v915_v43 = vadd.f32 %v2632_v24, %v2626_v4 }
 0x28a   : > { %1740 = vpow2.f32 %v872_v34  ;;  %v876_v61 = vmul.f32 1.442695, %v818_v62  ;;  %v878_v63 = vmul.f32 1.442695, %v819_v39 }
 0x28b   : > { %1742 = vpow2.f32 %v874_v3  ;;  %916 = vadd.xlane.f32.xlu1 %v915_v43 }
 0x28c   : > { %v2638_v36 = vpop.eup %1732  ;;  %1744 = vpow2.f32 %v876_v61 }
 0x28d   : > { %v2640_v16 = vpop.eup %1734  ;;  %1746 = vpow2.f32 %v878_v63  ;;  %v788_v59 = vpop.xlane.xlu0 %787 }
 0x28e   : > { %v2642_v19 = vpop.eup %1736  ;;  %v820_v27 = vsub.f32 %v2538_v0, %v788_v59  ;;  %v821_v54 = vsub.f32 %v2540_v13, %v788_v59  ;;  %v918_v38 = vadd.f32 %v2640_v16, %v2638_v36 }
 0x28f   : > { %v2648_v20 = vpop.eup %1738  ;;  %v791_v48 = vpop.xlane.xlu1 %790 }
 0x290   : > { %v880_v15 = vmul.f32 1.442695, %v820_v27  ;;  %v882_v21 = vmul.f32 1.442695, %v821_v54  ;;  %919 = vadd.xlane.f32.xlu0 %v918_v38  ;;  %v822_v17 = vsub.f32 %v2542_v47, %v791_v48  ;;  %v823_v10 = vsub.f32 %v2546_v14, %v791_v48 }
 0x291   : > { %v921_v56 = vadd.f32 %v2648_v20, %v2642_v19 }
 0x292   : > { %1748 = vpow2.f32 %v880_v15  ;;  %v884_v0 = vmul.f32 1.442695, %v822_v17  ;;  %v886_v7 = vmul.f32 1.442695, %v823_v10 }
 0x293   : > { %1750 = vpow2.f32 %v882_v21  ;;  %922 = vadd.xlane.f32.xlu1 %v921_v56 }
 0x294   : > { %v2654_v13 = vpop.eup %1740  ;;  %1752 = vpow2.f32 %v884_v0 }
 0x295   : > { %v2656_v11 = vpop.eup %1742  ;;  %1754 = vpow2.f32 %v886_v7 }
 0x296   : > { %v2658_v45 = vpop.eup %1744  ;;  %v924_v47 = vadd.f32 %v2656_v11, %v2654_v13 }
 0x297   : > { %v2662_v14 = vpop.eup %1746 }
 0x298   : > { %925 = vadd.xlane.f32.xlu0 %v924_v47  ;;  %v927_v1 = vadd.f32 %v2662_v14, %v2658_v45 }
 0x29a   : > { %928 = vadd.xlane.f32.xlu1 %v927_v1 }
 0x29c   : > { %v2666_v2 = vpop.eup %1748 }
 0x29d   : > { %v2668_v6 = vpop.eup %1750 }
 0x29e   : > { %v2670_v34 = vpop.eup %1752  ;;  %v930_v3 = vadd.f32 %v2668_v6, %v2666_v2 }
 0x29f   : > { %v2674_v62 = vpop.eup %1754 }
 0x2a0   : > { %931 = vadd.xlane.f32.xlu0 %v930_v3  ;;  %v933_v39 = vadd.f32 %v2674_v62, %v2670_v34 }
 0x2a2   : > { %934 = vadd.xlane.f32.xlu1 %v933_v39 }
 0x2f5   : > { %v890_v43 = vpop.xlane.xlu0 %889 }
 0x2f6   : > { %1756 = vrcp.f32 %v890_v43 }
 0x2f9   : > { %v893_v61 = vpop.xlane.xlu1 %892 }
 0x2fa   : > { %1758 = vrcp.f32 %v893_v61 }
 0x2fd   : > { %v896_v63 = vpop.xlane.xlu0 %895 }
 0x2fe   : > { %1760 = vrcp.f32 %v896_v63 }
 0x300   : > { %v1757_v27 = vpop.eup %1756 }
 0x301   : > { %v899_v59 = vpop.xlane.xlu1 %898  ;;  %v953_v48 = vmul.f32 %v1757_v27, %v2560_v60  ;;  %v952_v21 = vmul.f32 %v1757_v27, %v2558_v33 }
 0x302   : > { %1762 = vrcp.f32 %v899_v59 }
 0x304   : > { %v1759_v54 = vpop.eup %1758 }
 0x305   : > { %v902_v38 = vpop.xlane.xlu0 %901  ;;  %v955_v15 = vmul.f32 %v1759_v54, %v2570_v51  ;;  %v954_v17 = vmul.f32 %v1759_v54, %v2566_v53 }
 0x306   : > { %1764 = vrcp.f32 %v902_v38 }
 0x307   : > { %v985_v10 = vpack.c.bf16 %v955_v15, %v953_v48  ;;  %v984_v56 = vpack.c.bf16 %v954_v17, %v952_v21 }
 0x308   : > { %v905_v0 = vpop.xlane.xlu1 %904  ;;  %v1761_v7 = vpop.eup %1760 }
 0x309   : > { %1766 = vrcp.f32 %v905_v0  ;;  %1048 = vmatprep.mubr.bf16.mxu1 %v985_v10  ;;  %v957_v3 = vmul.f32 %v1761_v7, %v2576_v57  ;;  %v956_v51 = vmul.f32 %v1761_v7, %v2574_v8 }
 0x30a   : > { %1049 = vmatmul.mubr.bf16.vlgmr.msra.gmra.mrb[0].mxu1 %v984_v56 }
 0x30c   : > { %v1763_v47 = vpop.eup %1762 }
 0x30d   : > { %v908_v1 = vpop.xlane.xlu0 %907  ;;  %v959_v60 = vmul.f32 %v1763_v47, %v2586_v49  ;;  %v958_v33 = vmul.f32 %v1763_v47, %v2582_v58 }
 0x30e   : > { %1768 = vrcp.f32 %v908_v1 }
 0x30f   : > { %v987_v53 = vpack.c.bf16 %v959_v60, %v957_v3  ;;  %v986_v39 = vpack.c.bf16 %v958_v33, %v956_v51 }
 0x310   : > { %v911_v43 = vpop.xlane.xlu1 %910  ;;  %v1765_v61 = vpop.eup %1764 }
 0x311   : > { %1770 = vrcp.f32 %v911_v43  ;;  %1056 = vmatprep.mubr.bf16.mxu1 %v987_v53  ;;  %v961_v59 = vmul.f32 %v1765_v61, %v2592_v12  ;;  %v960_v8 = vmul.f32 %v1765_v61, %v2590_v52 }
 0x312   : > { %1057 = vmatmul.mubr.bf16.gmra.mrb[4].mxu1 %v986_v39 }
 0x313   : > { %v1767_v63 = vpop.eup %1766 }
 0x314   : > { %v963_v27 = vmul.f32 %v1767_v63, %v2600_v25  ;;  %v962_v57 = vmul.f32 %v1767_v63, %v2594_v29 }
 0x315   : > { %v914_v49 = vpop.xlane.xlu0 %913 }
 0x316   : > { %v989_v54 = vpack.c.bf16 %v963_v27, %v961_v59  ;;  %1772 = vrcp.f32 %v914_v49  ;;  %v988_v38 = vpack.c.bf16 %v962_v57, %v960_v8 }
 0x318   : > { %v917_v58 = vpop.xlane.xlu1 %916  ;;  %1064 = vmatprep.mubr.bf16.mxu1 %v989_v54  ;;  %v1769_v48 = vpop.eup %1768 }
 0x319   : > { %1774 = vrcp.f32 %v917_v58  ;;  %v965_v21 = vmul.f32 %v1769_v48, %v2608_v42  ;;  %v964_v10 = vmul.f32 %v1769_v48, %v2606_v5 }
 0x31a   : > { %1065 = vmatmul.mubr.bf16.gmra.mrb[8].mxu1 %v988_v38 }
 0x31b   : > { %v1771_v15 = vpop.eup %1770 }
 0x31c   : > { %v967_v12 = vmul.f32 %v1771_v15, %v2616_v50  ;;  %v966_v25 = vmul.f32 %v1771_v15, %v2610_v18  ;;  %v1146_v15 = vld [vmem:[#allocation7 + $0x8] sm:$0xff] }
 0x31d   : > { %v920_v17 = vpop.xlane.xlu0 %919 }
 0x31e   : > { %v991_v29 = vpack.c.bf16 %v967_v12, %v965_v21  ;;  %1776 = vrcp.f32 %v920_v17  ;;  %v990_v56 = vpack.c.bf16 %v966_v25, %v964_v10  ;;  %v1113_v12 = vld [vmem:[#allocation10] sm:$0xff]  ;;  %v1114_v25 = vld [vmem:[#allocation10 + $0x8] sm:$0xff] }
 0x320   : > { %v923_v52 = vpop.xlane.xlu1 %922  ;;  %1072 = vmatprep.mubr.bf16.mxu1 %v991_v29  ;;  %v1773_v0 = vpop.eup %1772 }
 0x321   : > { %1778 = vrcp.f32 %v923_v52  ;;  %v969_v47 = vmul.f32 %v1773_v0, %v2624_v9  ;;  %v968_v3 = vmul.f32 %v1773_v0, %v2622_v30 }
 0x322   : > { %1073 = vmatmul.mubr.bf16.gmra.mrb[12].mxu1 %v990_v56  ;;  %v1115_v56 = vld [vmem:[#allocation10 + $0x10] sm:$0xff] }
 0x323   : > { %v1775_v7 = vpop.eup %1774 }
 0x324   : > { %v971_v42 = vmul.f32 %v1775_v7, %v2632_v24  ;;  %v970_v50 = vmul.f32 %v1775_v7, %v2626_v4 }
 0x325   : > { %v926_v1 = vpop.xlane.xlu0 %925 }
 0x326   : > { %1780 = vrcp.f32 %v926_v1  ;;  %v993_v18 = vpack.c.bf16 %v971_v42, %v969_v47  ;;  %v992_v60 = vpack.c.bf16 %v970_v50, %v968_v3  ;;  %v1117_v3 = vld [vmem:[#allocation10 + $0x20] sm:$0xff] }
 0x327   : > { %v929_v5 = vpop.xlane.xlu1 %928 }
 0x328   : > { %1782 = vrcp.f32 %v929_v5  ;;  %1080 = vmatprep.mubr.bf16.mxu1 %v993_v18  ;;  %v1777_v51 = vpop.eup %1776  ;;  %v1118_v5 = vld [vmem:[#allocation10 + $0x28] sm:$0xff] }
 0x329   : > { %v973_v53 = vmul.f32 %v1777_v51, %v2640_v16  ;;  %v972_v43 = vmul.f32 %v1777_v51, %v2638_v36 }
 0x32a   : > { %1081 = vmatmul.mubr.bf16.gmra.mrb[16].mxu1 %v992_v60 }
 0x32b   : > { %v1779_v33 = vpop.eup %1778 }
 0x32c   : > { %v975_v9 = vmul.f32 %v1779_v33, %v2648_v20  ;;  %v974_v24 = vmul.f32 %v1779_v33, %v2642_v19 }
 0x32d   : > { %v932_v39 = vpop.xlane.xlu0 %931 }
 0x32e   : > { %1784 = vrcp.f32 %v932_v39  ;;  %v995_v4 = vpack.c.bf16 %v975_v9, %v973_v53  ;;  %v994_v63 = vpack.c.bf16 %v974_v24, %v972_v43  ;;  %v1120_v43 = vld [vmem:[#allocation10 + $0x38] sm:$0xff] }
 0x32f   : > { %v935_v61 = vpop.xlane.xlu1 %934 }
 0x330   : > { %v1781_v30 = vpop.eup %1780  ;;  %1786 = vrcp.f32 %v935_v61  ;;  %1088 = vmatprep.mubr.bf16.mxu1 %v995_v4  ;;  %v1119_v4 = vld [vmem:[#allocation10 + $0x30] sm:$0xff] }
 0x331   : > { %v977_v27 = vmul.f32 %v1781_v30, %v2656_v11  ;;  %v976_v19 = vmul.f32 %v1781_v30, %v2654_v13 }
 0x332   : > { %v1783_v59 = vpop.eup %1782  ;;  %1089 = vmatmul.mubr.bf16.gmra.mrb[20].mxu1 %v994_v63 }
 0x333   : > { %v979_v16 = vmul.f32 %v1783_v59, %v2662_v14  ;;  %v978_v20 = vmul.f32 %v1783_v59, %v2658_v45  ;;  %v1145_v45 = vld [vmem:[#allocation7] sm:$0xff] }
 0x334   : > { %v1153_v13 = vpack.c.bf16 %v1146_v15, %v1145_v45 }
 0x335   : > { %v997_v57 = vpack.c.bf16 %v979_v16, %v977_v27  ;;  %v996_v54 = vpack.c.bf16 %v978_v20, %v976_v19  ;;  %v1122_v19 = vld [vmem:[#allocation10 + $0x48] sm:$0xff] }
 0x337   : > { %1096 = vmatprep.mubr.bf16.mxu1 %v997_v57  ;;  %v1121_v57 = vld [vmem:[#allocation10 + $0x40] sm:$0xff] }
 0x338   : > { %v1785_v49 = vpop.eup %1784 }
 0x339   : > { %v981_v8 = vmul.f32 %v1785_v49, %v2668_v6  ;;  %v980_v11 = vmul.f32 %v1785_v49, %v2666_v2  ;;  %v1116_v2 = vld [vmem:[#allocation10 + $0x18] sm:$0xff] }
 0x33a   : > { %v1787_v36 = vpop.eup %1786  ;;  %1097 = vmatmul.mubr.bf16.gmra.mrb[24].mxu1 %v996_v54 }
 0x33b   : > { %v983_v58 = vmul.f32 %v1787_v36, %v2674_v62  ;;  %v982_v38 = vmul.f32 %v1787_v36, %v2670_v34 }
 0x33d   : > { %v999_v48 = vpack.c.bf16 %v983_v58, %v981_v8  ;;  %v998_v14 = vpack.c.bf16 %v982_v38, %v980_v11  ;;  %v1123_v11 = vld [vmem:[#allocation10 + $0x50] sm:$0xff] }
 0x33f   : > { %1104 = vmatprep.mubr.bf16.mxu1 %v999_v48 }
 0x342   : > { %1105 = vmatmul.mubr.bf16.gmra.mrb[28].mxu1 %v998_v14  ;;  %v1124_v14 = vld [vmem:[#allocation10 + $0x58] sm:$0xff] }
 0x343   : > { %1588 = vmatprep.mubr.bf16.mxu1 %v1153_v13 }
 0x3dd   : > { %v1050_v21 = vpop.f32.mrb[0].mxu1 }
 0x3de   : > { %v1052_v17 = vpop.f32.mrb[1].mxu1  ;;  %v1129_v6 = vmul.f32 %v1113_v12, %v1050_v21 }
 0x3df   : > { %v1053_v29 = vpop.f32.mrb[2].mxu1 }
 0x3e0   : > { %v1130_v10 = vmul.f32 %v1114_v25, %v1053_v29  ;;  %v1055_v62 = vpop.f32.mrb[3].mxu1  ;;  %v1125_v29 = vld [vmem:[#allocation10 + $0x60] sm:$0xff] }
 0x3e2   : > { %v1157_v52 = vpack.c.bf16 %v1130_v10, %v1129_v6  ;;  %v1126_v6 = vld [vmem:[#allocation10 + $0x68] sm:$0xff] }
 0x3e4   : > { %1572 = vmatprep.subr.bf16.mxu1 %v1157_v52 }
 0x3e5   : > { %v1058_v34 = vpop.f32.mrb[4].mxu1  ;;  %1573 = vmatpush3.bf16.xpose.msra.mxu1 %v1157_v52 }
 0x3e6   : > { %v1060_v0 = vpop.f32.mrb[5].mxu1  ;;  %v1131_v47 = vmul.f32 %v1115_v56, %v1058_v34 }
 0x3e7   : > { %v1061_v7 = vpop.f32.mrb[6].mxu1 }
 0x3e8   : > { %v1132_v42 = vmul.f32 %v1116_v2, %v1061_v7  ;;  %v1063_v50 = vpop.f32.mrb[7].mxu1  ;;  %v1127_v7 = vld [vmem:[#allocation10 + $0x70] sm:$0xff] }
 0x3ea   : > { %v1158_v1 = vpack.c.bf16 %v1132_v42, %v1131_v47  ;;  %v1128_v47 = vld [vmem:[#allocation10 + $0x78] sm:$0xff] }
 0x3ec   : > { %1574 = vmatprep.subr.bf16.mxu1 %v1158_v1 }
 0x3ed   : > { %v1066_v18 = vpop.f32.mrb[8].mxu1  ;;  %1575 = vmatpush3.bf16.xpose.msra.mxu1 %v1158_v1 }
 0x3ee   : > { %v1068_v60 = vpop.f32.mrb[9].mxu1  ;;  %v1133_v33 = vmul.f32 %v1117_v3, %v1066_v18 }
 0x3ef   : > { %v1069_v51 = vpop.f32.mrb[10].mxu1  ;;  %v1147_v60 = vld [vmem:[#allocation7 + $0x10] sm:$0xff] }
 0x3f0   : > { %v1134_v53 = vmul.f32 %v1118_v5, %v1069_v51  ;;  %v1071_v9 = vpop.f32.mrb[11].mxu1  ;;  %v1148_v51 = vld [vmem:[#allocation7 + $0x18] sm:$0xff] }
 0x3f1   : > { %v1150_v9 = vld [vmem:[#allocation7 + $0x28] sm:$0xff] }
 0x3f2   : > { %v1159_v24 = vpack.c.bf16 %v1134_v53, %v1133_v33  ;;  %v2896_v33 = vpack.c.bf16 %v2359_v28, %v2352_v23  ;;  %v1149_v53 = vld [vmem:[#allocation7 + $0x20] sm:$0xff]  ;;  %v2899_v23 = vpack.c.bf16 %v2369_v35, %v2363_v31  ;;  %v2900_v28 = vpack.c.bf16 %v2387_v46, %v2380_v41  ;;  %v2908_v31 = vld [vmem:[#allocation22_spill] sm:$0xff]  ;;  %v2911_v41 = vld [vmem:[#allocation21_spill] sm:$0xff] }
 0x3f3   : > { %v2909_v35 = vld [vmem:[#allocation20_spill] sm:$0xff]  ;;  %v2912_v46 = vld [vmem:[#allocation19_spill] sm:$0xff] }
 0x3f4   : > { %1576 = vmatprep.subr.bf16.mxu1 %v1159_v24 }
 0x3f5   : > { %v1074_v39 = vpop.f32.mrb[12].mxu1  ;;  %1577 = vmatpush3.bf16.xpose.msra.mxu1 %v1159_v24  ;;  %v1154_v24 = vpack.c.bf16 %v1148_v51, %v1147_v60 }
 0x3f6   : > { %v1076_v61 = vpop.f32.mrb[13].mxu1  ;;  %v1135_v63 = vmul.f32 %v1119_v4, %v1074_v39  ;;  %v1155_v39 = vpack.c.bf16 %v1150_v9, %v1149_v53  ;;  %v2897_v4 = vpack.c.bf16 %v2355_v26, %v2349_v22  ;;  %v2901_v22 = vpack.c.bf16 %v2383_v44, %v2377_v40  ;;  %v2914_v40 = vld [vmem:[#allocation26_spill] sm:$0xff]  ;;  %v2915_v44 = vld [vmem:[#allocation24_spill] sm:$0xff] }
 0x3f7   : > { %v1077_v30 = vpop.f32.mrb[14].mxu1  ;;  %v1152_v61 = vld [vmem:[#allocation7 + $0x38] sm:$0xff]  ;;  %v2902_v26 = vmov 0  }
 0x3f8   : > { %v1136_v59 = vmul.f32 %v1120_v43, %v1077_v30  ;;  %v1079_v27 = vpop.f32.mrb[15].mxu1  ;;  %v1151_v43 = vld [vmem:[#allocation7 + $0x30] sm:$0xff]  ;;  %v2898_v30 = vpack.c.bf16 %v2373_v37, %v2366_v32 }
 0x3f9   : > { %v2905_v37 = vld [vmem:[#allocation18_spill] sm:$0xff]  ;;  %v2906_v27 = vld [vmem:[#allocation16_spill] sm:$0xff] }
 0x3fa   : > { %v1160_v16 = vpack.c.bf16 %v1136_v59, %v1135_v63  ;;  %v1156_v63 = vpack.c.bf16 %v1152_v61, %v1151_v43  ;;  %v2903_v59 = vld [vmem:[#allocation17_spill] sm:$0xff] }
 0x3fb   : > { %v2904_v32 = vpack.c.bf16 %v2401_v55, %v2903_v59 }
 0x3fc   : > { %1578 = vmatprep.subr.bf16.mxu1 %v1160_v16 }
 0x3fd   : > { %v1082_v20 = vpop.f32.mrb[16].mxu1  ;;  %1579 = vmatpush3.bf16.xpose.msra.mxu1 %v1160_v16  ;;  %v2907_v16 = vpack.c.bf16 %v2905_v37, %v2906_v27 }
 0x3fe   : > { %v1084_v49 = vpop.f32.mrb[17].mxu1  ;;  %v1137_v36 = vmul.f32 %v1121_v57, %v1082_v20  ;;  %v2910_v20 = vpack.c.bf16 %v2908_v31, %v2909_v35  ;;  %v2913_v57 = vpack.c.bf16 %v2911_v41, %v2912_v46 }
 0x3ff   : > { %v1085_v54 = vpop.f32.mrb[18].mxu1  ;;  %v2917_v49 = vld [vmem:[#allocation25_spill] sm:$0xff] }
 0x400   : > { %v1138_v8 = vmul.f32 %v1122_v19, %v1085_v54  ;;  %v1087_v58 = vpop.f32.mrb[19].mxu1  ;;  %v2916_v19 = vpack.c.bf16 %v2914_v40, %v2915_v44  ;;  %v2918_v54 = vld [vmem:[#allocation23_spill] sm:$0xff] }
 0x401   : > { %v2919_v55 = vpack.c.bf16 %v2917_v49, %v2918_v54 }
 0x402   : > { %v1161_v38 = vpack.c.bf16 %v1138_v8, %v1137_v36  ;;  %v2920_v36 = vld [vmem:[#allocation30_spill] sm:$0xff]  ;;  %v2921_v8 = vld [vmem:[#allocation28_spill] sm:$0xff] }
 0x403   : > { %v2922_v58 = vpack.c.bf16 %v2920_v36, %v2921_v8 }
 0x404   : > { %1580 = vmatprep.subr.bf16.mxu1 %v1161_v38 }
 0x405   : > { %v1090_v48 = vpop.f32.mrb[20].mxu1  ;;  %1581 = vmatpush3.bf16.xpose.msra.mxu1 %v1161_v38  ;;  %v2923_v38 = vld [vmem:[#allocation29_spill] sm:$0xff] }
 0x406   : > { %v1092_v45 = vpop.f32.mrb[21].mxu1  ;;  %v1139_v13 = vmul.f32 %v1123_v11, %v1090_v48  ;;  %v2924_v48 = vld [vmem:[#allocation27_spill] sm:$0xff] }
 0x407   : > { %v1093_v15 = vpop.f32.mrb[22].mxu1  ;;  %v2925_v11 = vpack.c.bf16 %v2923_v38, %v2924_v48  ;;  %v2927_v45 = vld [vmem:[#allocation32_spill] sm:$0xff] }
 0x408   : > { %v1140_v21 = vmul.f32 %v1124_v14, %v1093_v15  ;;  %v1095_v12 = vpop.f32.mrb[23].mxu1  ;;  %v2926_v14 = vld [vmem:[#allocation34_spill] sm:$0xff] }
 0x409   : > { %v2928_v15 = vpack.c.bf16 %v2926_v14, %v2927_v45 }
 0x40a   : > { %v1162_v25 = vpack.c.bf16 %v1140_v21, %v1139_v13  ;;  %v2929_v13 = vld [vmem:[#allocation33_spill] sm:$0xff]  ;;  %v2930_v21 = vld [vmem:[#allocation31_spill] sm:$0xff] }
 0x40b   : > { %v2931_v12 = vpack.c.bf16 %v2929_v13, %v2930_v21 }
 0x40c   : > { %1582 = vmatprep.subr.bf16.mxu1 %v1162_v25 }
 0x40d   : > { %v1098_v17 = vpop.f32.mrb[24].mxu1  ;;  %1583 = vmatpush3.bf16.xpose.msra.mxu1 %v1162_v25  ;;  %v1251_v25 = vld [vmem:[#allocation8 + $0x8] sm:$0xff] }
 0x40e   : > { %v1100_v10 = vpop.f32.mrb[25].mxu1  ;;  %v1141_v52 = vmul.f32 %v1125_v29, %v1098_v17  ;;  %1265 = vperm.xlu1 %1691, %v1251_v25   ;;  %v1250_v17 = vld [vmem:[#allocation8] sm:$0xff]  ;;  %v1252_v29 = vld [vmem:[#allocation8 + $0x10] sm:$0xff] }
 0x40f   : > { %v1101_v62 = vpop.f32.mrb[26].mxu1  ;;  %1260 = vperm.xlu0 %1690, %v1250_v17   ;;  %v1254_v10 = vld [vmem:[#allocation8 + $0x20] sm:$0xff] }
 0x410   : > { %v1142_v34 = vmul.f32 %v1126_v6, %v1101_v62  ;;  %v1103_v56 = vpop.f32.mrb[27].mxu1  ;;  %v1253_v6 = vld [vmem:[#allocation8 + $0x18] sm:$0xff]  ;;  %v1255_v62 = vld [vmem:[#allocation8 + $0x28] sm:$0xff] }
 0x412   : > { %v1163_v2 = vpack.c.bf16 %v1142_v34, %v1141_v52  ;;  %1270 = vperm.xlu1 %1691, %v1252_v29   ;;  %v1256_v52 = vld [vmem:[#allocation8 + $0x30] sm:$0xff]  ;;  %v1257_v34 = vld [vmem:[#allocation8 + $0x38] sm:$0xff] }
 0x414   : > { %1584 = vmatprep.subr.bf16.mxu1 %v1163_v2 }
 0x415   : > { %v1106_v0 = vpop.f32.mrb[28].mxu1  ;;  %1585 = vmatpush3.bf16.xpose.msra.mxu1 %v1163_v2 }
 0x416   : > { %v1108_v42 = vpop.f32.mrb[29].mxu1  ;;  %v1143_v1 = vmul.f32 %v1127_v7, %v1106_v0  ;;  %1275 = vperm.xlu1 %1691, %v1253_v6  }
 0x417   : > { %v1109_v50 = vpop.f32.mrb[30].mxu1 }
 0x418   : > { %v1144_v18 = vmul.f32 %v1128_v47, %v1109_v50  ;;  %v1111_v3 = vpop.f32.mrb[31].mxu1 }
 0x41a   : > { %v1164_v5 = vpack.c.bf16 %v1144_v18, %v1143_v1  ;;  %1280 = vperm.xlu1 %1691, %v1254_v10  }
 0x41c   : > { %1586 = vmatprep.subr.bf16.mxu1 %v1164_v5 }
 0x41d   : > { %1587 = vmatpush3.bf16.xpose.msra.mxu1 %v1164_v5 }
 0x41e   : > { %1298 = vmatprep.subr.bf16.mxu1 %v2896_v33  ;;  %1285 = vperm.xlu1 %1691, %v1255_v62  }
 0x422   : > { %1290 = vperm.xlu1 %1691, %v1256_v52  }
 0x424   : > { %1589 = vmatmul.mubr.bf16.vlgmr.msra.gmra.mrb[32].mxu1 %v1154_v24 }
 0x425   : > { %1299 = vmatpush1.bf16.msra.mxu1 %v2897_v4  ;;  %1592 = vmatprep.mubr.bf16.mxu1 %v1155_v39 }
 0x426   : > { %1300 = vmatprep.subr.bf16.mxu1 %v2898_v30  ;;  %1295 = vperm.xlu1 %1691, %v1257_v34  }
 0x429   : > { %1301 = vmatpush1.bf16.msra.mxu1 %v2899_v23 }
 0x42a   : > { %1302 = vmatprep.subr.bf16.mxu1 %v2900_v28 }
 0x42c   : > { %1593 = vmatmul.mubr.bf16.gmra.mrb[36].mxu1 %v1156_v63 }
 0x42d   : > { %1303 = vmatpush1.bf16.msra.mxu1 %v2901_v22  ;;  %1330 = vmatprep.mubr.bf16.mxu1 %v2902_v26 }
 0x42e   : > { %1304 = vmatprep.subr.bf16.mxu1 %v2904_v32 }
 0x431   : > { %1305 = vmatpush1.bf16.msra.mxu1 %v2907_v16 }
 0x432   : > { %1306 = vmatprep.subr.bf16.mxu1 %v2910_v20 }
 0x435   : > { %1307 = vmatpush1.bf16.msra.mxu1 %v2913_v57 }
 0x436   : > { %1308 = vmatprep.subr.bf16.mxu1 %v2916_v19 }
 0x439   : > { %1309 = vmatpush1.bf16.msra.mxu1 %v2919_v55 }
 0x43a   : > { %1310 = vmatprep.subr.bf16.mxu1 %v2922_v58 }
 0x43d   : > { %1311 = vmatpush1.bf16.msra.mxu1 %v2925_v11 }
 0x43e   : > { %1312 = vmatprep.subr.bf16.mxu1 %v2928_v15 }
 0x441   : > { %1313 = vmatpush1.bf16.msra.mxu1 %v2931_v12 }
 0x48d   : > { %v1266_v51 = vpop.permute.xlu1 %1265 }
 0x48e   : > { %v1261_v53 = vpop.permute.xlu0 %1260 }
 0x491   : > { %v1271_v33 = vpop.permute.xlu1 %1270 }
 0x495   : > { %v1276_v4 = vpop.permute.xlu1 %1275 }
 0x499   : > { %v1281_v28 = vpop.permute.xlu1 %1280 }
 0x49d   : > { %v1286_v35 = vpop.permute.xlu1 %1285 }
 0x4a1   : > { %v1291_v49 = vpop.permute.xlu1 %1290 }
 0x4a5   : > { %v1296_v58 = vpop.permute.xlu1 %1295 }
 0x4f7   : > { %v1590_v56 = vpop.f32.mrb[32].mxu1 }
 0x4f8   : > { %v1199_v2 = vpop.f32.mrb[33].mxu1 }
 0x4f9   : > { %v1591_v0 = vpop.f32.mrb[34].mxu1 }
 0x4fa   : > { %v1231_v7 = vpack.c.bf16 %v1591_v0, %v1590_v56  ;;  %v1202_v47 = vpop.f32.mrb[35].mxu1 }
 0x4fb   : > { %v1230_v42 = vpack.c.bf16 %v1202_v47, %v1199_v2 }
 0x4fd   : > { %1331 = vmatmul.mubr.bf16.vlgmr.msra.gmra.mrb[40].mxu1 %v1230_v42 }
 0x4fe   : > { %1340 = vmatprep.mubr.bf16.mxu1 %v2902_v26 }
 0x4ff   : > { %v1594_v50 = vpop.f32.mrb[36].mxu1 }
 0x500   : > { %v1215_v1 = vpop.f32.mrb[37].mxu1 }
 0x501   : > { %v1595_v18 = vpop.f32.mrb[38].mxu1 }
 0x502   : > { %v1233_v3 = vpack.c.bf16 %v1595_v18, %v1594_v50  ;;  %v1218_v5 = vpop.f32.mrb[39].mxu1 }
 0x503   : > { %v1232_v60 = vpack.c.bf16 %v1218_v5, %v1215_v1 }
 0x505   : > { %1341 = vmatmul.mubr.bf16.gmra.mrb[44].mxu1 %v1231_v7 }
 0x506   : > { %1350 = vmatprep.mubr.bf16.mxu1 %v2902_v26 }
 0x50d   : > { %1351 = vmatmul.mubr.bf16.gmra.mrb[48].mxu1 %v1232_v60 }
 0x50e   : > { %1360 = vmatprep.mubr.bf16.mxu1 %v2902_v26 }
 0x515   : > { %1361 = vmatmul.mubr.bf16.gmra.mrb[52].mxu1 %v1233_v3 }
 0x5d0   : > { %v1332_v9 = vpop.f32.mrb[40].mxu1 }
 0x5d1   : > { %v1333_v24 = vadd.f32 %v1332_v9, %v1261_v53  ;;  %v1334_v39 = vpop.f32.mrb[41].mxu1 }
 0x5d2   : > { %v1335_v43 = vadd.f32 %v1334_v39, %v1261_v53  ;;  %v1336_v61 = vpop.f32.mrb[42].mxu1 }
 0x5d3   : > { %1371 = vst [vmem:[%s2764_s24] sm:$0xff] %v1333_v24  ;;  %v1337_v30 = vadd.f32 %v1336_v61, %v1266_v51  ;;  %v1338_v63 = vpop.f32.mrb[43].mxu1 }
 0x5d4   : > { %1372 = vst [vmem:[%s2764_s24 + $0x8] sm:$0xff] %v1335_v43  ;;  %v1339_v23 = vadd.f32 %v1338_v63, %v1266_v51 }
 0x5d5   : > { %1373 = vst [vmem:[%s2764_s24 + $0x10] sm:$0xff] %v1337_v30 }
 0x5d6   : > { %1374 = vst [vmem:[%s2764_s24 + $0x18] sm:$0xff] %v1339_v23 }
 0x5d8   : > { %v1342_v22 = vpop.f32.mrb[44].mxu1 }
 0x5d9   : > { %v1343_v26 = vadd.f32 %v1342_v22, %v1271_v33  ;;  %v1344_v59 = vpop.f32.mrb[45].mxu1 }
 0x5da   : > { %v1345_v32 = vadd.f32 %v1344_v59, %v1271_v33  ;;  %v1346_v37 = vpop.f32.mrb[46].mxu1 }
 0x5db   : > { %1375 = vst [vmem:[%s2764_s24 + $0x20] sm:$0xff] %v1343_v26  ;;  %v1347_v27 = vadd.f32 %v1346_v37, %v1276_v4  ;;  %v1348_v16 = vpop.f32.mrb[47].mxu1 }
 0x5dc   : > { %1376 = vst [vmem:[%s2764_s24 + $0x28] sm:$0xff] %v1345_v32  ;;  %v1349_v31 = vadd.f32 %v1348_v16, %v1276_v4 }
 0x5dd   : > { %1377 = vst [vmem:[%s2764_s24 + $0x30] sm:$0xff] %v1347_v27 }
 0x5de   : > { %1378 = vst [vmem:[%s2764_s24 + $0x38] sm:$0xff] %v1349_v31 }
 0x5e0   : > { %v1352_v20 = vpop.f32.mrb[48].mxu1 }
 0x5e1   : > { %v1353_v41 = vadd.f32 %v1352_v20, %v1281_v28  ;;  %v1354_v46 = vpop.f32.mrb[49].mxu1 }
 0x5e2   : > { %v1355_v57 = vadd.f32 %v1354_v46, %v1281_v28  ;;  %v1356_v40 = vpop.f32.mrb[50].mxu1 }
 0x5e3   : > { %1379 = vst [vmem:[%s2764_s24 + $0x40] sm:$0xff] %v1353_v41  ;;  %v1357_v44 = vadd.f32 %v1356_v40, %v1286_v35  ;;  %v1358_v19 = vpop.f32.mrb[51].mxu1 }
 0x5e4   : > { %1380 = vst [vmem:[%s2764_s24 + $0x48] sm:$0xff] %v1355_v57  ;;  %v1359_v54 = vadd.f32 %v1358_v19, %v1286_v35 }
 0x5e5   : > { %1381 = vst [vmem:[%s2764_s24 + $0x50] sm:$0xff] %v1357_v44 }
 0x5e6   : > { %1382 = vst [vmem:[%s2764_s24 + $0x58] sm:$0xff] %v1359_v54 }
 0x5e8   : > { %v1362_v55 = vpop.f32.mrb[52].mxu1 }
 0x5e9   : > { %v1363_v36 = vadd.f32 %v1362_v55, %v1291_v49  ;;  %v1364_v8 = vpop.f32.mrb[53].mxu1 }
 0x5ea   : > { %v1365_v38 = vadd.f32 %v1364_v8, %v1291_v49  ;;  %v1366_v48 = vpop.f32.mrb[54].mxu1 }
 0x5eb   : > { %1383 = vst [vmem:[%s2764_s24 + $0x60] sm:$0xff] %v1363_v36  ;;  %v1367_v11 = vadd.f32 %v1366_v48, %v1296_v58  ;;  %v1368_v14 = vpop.f32.mrb[55].mxu1 }
 0x5ec   : > { %1384 = vst [vmem:[%s2764_s24 + $0x68] sm:$0xff] %v1365_v38  ;;  %v1369_v45 = vadd.f32 %v1368_v14, %v1296_v58 }
 0x5ed   : > { %1385 = vst [vmem:[%s2764_s24 + $0x70] sm:$0xff] %v1367_v11 }
 0x5ee   : > { %1386 = vst [vmem:[%s2764_s24 + $0x78] sm:$0xff] %v1369_v45 }
 0x5ef   : > { %1943 = shalt.err (!%p1940_p13)
}
 0x5f0   : > { %s1944_s16 = scalar_lea.hbm %s2784_s8, 2048  ;;  %s1948_s10 = scalar_lea.hbm %s2838_s5, 4096 }
 0x5f1   : > { %p1945_p9 = scmp.ne.s32.totalorder %s2784_s8, %s1944_s16  ;;  %p1949_p4 = scmp.lt.u32.totalorder %s2784_s8, %s2838_s5 }
 0x5f2   : > { %p1950_p8 = scmp.lt.u32.totalorder %s1948_s10, %s1944_s16  ;;  %p1952_p3 = scmp.lt.u32.totalorder %s1944_s16, %s2784_s8 }
 0x5f3   : > { %p1946_p0 = pnand %p1945_p9, %p2220_p10 }
 0x5f4   : > { %p1951_p6 = por %p1950_p8, %p1949_p4 }
 0x5f5   : > { %p1947_p11 = pneg %p1946_p0 }
 0x5f6   : > { %p1953_p5 = por %p1952_p3, %p1951_p6 }
 0x5f8   : > { %p1954_p7 = pnand %p1953_p5, %p1947_p11 }
 0x5fa   : > { %1957 = shalt.err (!%p1954_p7)
}
 0x5fb   : > { %s2017_s26 = smov 256   ;;  %s2018_s13 = smov 16  }
 0x5fc   : > { %1614 = dma.vmem_to_hbm [thread:$0]  (%p2220_p10), %s2786_s11, 2048, %s2784_s8, %s1388_s22, %s2017_s26, %s2017_s26, %s2018_s13  }
 0x5fd PF: > { %s1416_s15 = sand.u32 1, %s1992_s18   ;;  %p2932_p12 = scmp.ne.s32.totalorder %s2864_s25, 0 }
 0x5fe   : > { %p2933_p1 = scmp.ge.s32.totalorder %s2004_s21, 2  ;;  %s1417_s9 = scalar_lea.sflag [#allocation4], %s1416_s15 }
 0x600   : > { %p1634_p2 = pnand %p2933_p1, %p2932_p12 }
 0x602   : > { %1987 = dma.done.wait (!%p1634_p2), %s1417_s9, 2048  }
 0x603   : > { %1989 = vsyncadd (!%p1634_p2), %s1417_s9, 4294965248  ;;  %p20_p13 = scmp.ge.s32.totalorder %s2210_s14, 4   ;;  %s2934_s18 = smov %s1996_s19 }
 0x604   : > { %s2935_s19 = smov %s2000_s20  ;;  %s2936_s20 = smov %s2226_s7 }
 0x605   : > { %s2937_s21 = smov %s2210_s14  ;;  %22 = sbr.rel (!%p20_p13) target bundleno = 7 (0x7), region = 101 }
 0x60c   :  { %1422 = vsyncpa [#allocation3], 1 }
 0x60d   :  { %1424 = vsyncpa [#allocation3 + $0x1], 1 }
 0x60e   :  { %1425 = vsyncpa [#allocation6], 1 }
 0x60f   :  { %1426 = vsyncpa [#allocation9], 1 }
 0x610   :  { %1427 = vsyncpa [#allocation4], 1 }
 0x611   :  { %1429 = vsyncpa [#allocation4 + $0x1], 1 }

</bundles_post_ra>
